<compile_context>
chip_gen: v7x
topology: tpu7x:2x2x1
jax: 0.10.0
libtpu: 0.0.40
codegen_flags: <defaults>
</compile_context>

<pallas_src>
import functools

import jax
import jax.numpy as jnp
import numpy as np
from jax import lax
from jax.experimental import pallas as pl
from jax.experimental.pallas import tpu as pltpu

_BIG = 1e30    # stand-in for +inf when masking distances
_LANE = 128    # lane width of one vreg / inner sub-chunk width


def _loss_kernel(data_ref, pred_ref, pn2_ref, minx_ref, stats_ref,
                 sumy_ref, cnt_ref, uvs_ref,
                 *, n_lane_chunks, n_p_chunks, p_chunk):
    """One grid step over an (8, tile_s) packed slab.

    data_ref : (8, tile_s)   rows = [gt xyz | mask | uv_out | uv_gt]
    pred_ref : (P_pad, 8)    resident; columns 0..2 hold -2 * pred xyz
    pn2_ref  : (P_pad, 128)  resident; |pred|^2 broadcast over lanes (BIG for pad rows)
    minx_ref : (P_pad, 128)  output block, used as lane-deferred running-min accumulator
    stats_ref: (8, 128)      output block; rows 0..2 = [sumy, cnt, uv_l1] lane partials
    sumy/cnt/uvs_ref : (1, 128) scratch lane-wide partial sums
    """
    k = pl.program_id(1)

    @pl.when(k == 0)
    def _init():
        minx_ref[...] = jnp.full_like(minx_ref, _BIG)
        sumy_ref[...] = jnp.zeros_like(sumy_ref)
        cnt_ref[...] = jnp.zeros_like(cnt_ref)
        uvs_ref[...] = jnp.zeros_like(uvs_ref)

    # Per-step lane-wide partials kept in registers; merged into scratch once
    # per grid step (not once per sub-chunk).
    step_sumy = jnp.zeros((1, _LANE), jnp.float32)
    step_cnt = jnp.zeros((1, _LANE), jnp.float32)
    step_uvs = jnp.zeros((1, _LANE), jnp.float32)

    # Fully-unrolled inner loop over 128-lane sub-chunks (all offsets static).
    for c in range(n_lane_chunks):
        d = data_ref[:, pl.ds(c * _LANE, _LANE)]                 # (8, 128)
        gt = d[0:3, :]                                           # (3, 128)
        mask = d[3:4, :]                                         # (1, 128)
        uvo = d[4:6, :]                                          # (2, 128)
        uvg = d[6:8, :]                                          # (2, 128)

        gn2 = jnp.sum(gt * gt, axis=0, keepdims=True)            # (1, 128)
        pen = (1.0 - mask) * _BIG                                # (1, 128)

        # Strip-mine the pred axis so d2 never exceeds (p_chunk, 128).
        miny = None
        for pi in range(n_p_chunks):
            r0 = pi * p_chunk
            pr = pred_ref[pl.ds(r0, p_chunk), :]                 # (p_chunk, 8)
            # MXU cross term: pgneg = -2 * <pred, gt>.  Rows 3..7 of the slab
            # drop out because pred columns 3..7 are zero.
            pgneg = jnp.dot(pr, d, precision=lax.Precision.HIGHEST,
                            preferred_element_type=jnp.float32)  # (p_chunk, 128)
            d2 = jnp.maximum(pn2_ref[pl.ds(r0, p_chunk), :] + (gn2 + pgneg), 0.0)

            # pred -> masked-gt direction: lane-deferred elementwise running min
            # (additive BIG penalty kills masked-out columns; final 128->1 min
            #  happens in the wrapper).
            cur = minx_ref[pl.ds(r0, p_chunk), :]
            minx_ref[pl.ds(r0, p_chunk), :] = jnp.minimum(cur, d2 + pen)

            # gt -> pred direction: running min over the pred axis.
            rm = jnp.min(d2, axis=0, keepdims=True)              # (1, 128)
            miny = rm if miny is None else jnp.minimum(miny, rm)

        step_sumy = step_sumy + miny * mask
        step_cnt = step_cnt + mask
        step_uvs = step_uvs + jnp.sum(jnp.abs(uvo - uvg), axis=0, keepdims=True) * mask

    sumy_ref[...] = sumy_ref[...] + step_sumy
    cnt_ref[...] = cnt_ref[...] + step_cnt
    uvs_ref[...] = uvs_ref[...] + step_uvs

    @pl.when(k == pl.num_programs(1) - 1)
    def _finalize():
        stats_ref[0:1, :] = sumy_ref[...]
        stats_ref[1:2, :] = cnt_ref[...]
        stats_ref[2:3, :] = uvs_ref[...]
        stats_ref[3:8, :] = jnp.zeros((5, _LANE), jnp.float32)


def doc3d_uvstn_field_loss(model_outputs, model_inputs, ground_truth,
                           fwd_weight=1.0, pt_weight=1.0,
                           loss_mode='l1', scinv_lambda=1.0,
                           tile_s=2048, num_splits=1, vmem_limit_bytes=None):
    """JAX/Pallas equivalent of Doc3dUVSTNFieldLoss.forward (loss_mode='l1').

    num_splits: set to 2 on v7x (2 TensorCores/chip) to shard the sample axis
    across cores; keep 1 on v5e/v6e.
    """
    assert loss_mode == 'l1', "only loss_mode='l1' is implemented"
    del scinv_lambda  # unused by forward()

    object_mask = model_outputs['object_mask']     # (B, N) bool
    uv_out = model_outputs['uv_points']            # (B, N, 2)
    pred_points = model_outputs['surf_points']     # (1, P, 3)
    points_gt = model_inputs['wc']                 # (B, N, 3)
    uv_gt = ground_truth['uv_gt']                  # (B, N, 2)

    B, N = object_mask.shape
    S = B * N
    _, P, D = pred_points.shape
    C = uv_out.shape[2]
    assert D == 3 and C == 2
    num_splits = max(1, int(num_splits))

    # ---- sample-axis tiling -------------------------------------------------
    tile_s = max(_LANE, (int(tile_s) // _LANE) * _LANE)
    per_split_pad = -(-(-(-S // num_splits)) // _LANE) * _LANE   # ceil(S/splits) to lane mult
    tile_s = min(tile_s, per_split_pad)
    chunk = num_splits * tile_s
    S_pad = -(-S // chunk) * chunk
    T = S_pad // chunk                  # grid steps per core-split
    n_lane_chunks = tile_s // _LANE

    # ---- pred-axis strip-mining ---------------------------------------------
    if P <= _LANE:
        p_chunk = max(8, -(-P // 8) * 8)
        P_pad = p_chunk
    else:
        p_chunk = _LANE
        P_pad = -(-P // p_chunk) * p_chunk
    n_p_chunks = P_pad // p_chunk

    # ---- pack the lane-streamed data into one channel-major (8, S) slab ------
    mask_row = object_mask.reshape(1, S).astype(jnp.float32)
    gt_cs = points_gt.reshape(S, D).T.astype(jnp.float32)       # (3, S)
    uvo_cs = uv_out.reshape(S, C).T.astype(jnp.float32)         # (2, S)
    uvg_cs = uv_gt.reshape(S, C).T.astype(jnp.float32)          # (2, S)
    data = jnp.concatenate([gt_cs, mask_row, uvo_cs, uvg_cs], axis=0)   # (8, S)
    if S_pad != S:
        data = jnp.pad(data, ((0, 0), (0, S_pad - S)))          # mask=0 columns

    # ---- resident pred operands ----------------------------------------------
    pred = pred_points.reshape(P, D).astype(jnp.float32)
    pred_neg2 = jnp.zeros((P_pad, 8), jnp.float32).at[:P, 0:3].set(-2.0 * pred)
    pn2 = jnp.sum(pred * pred, axis=1)                          # (P,) |pred|^2
    pn2_col = jnp.full((P_pad,), _BIG, jnp.float32).at[:P].set(pn2)
    pn2b = jnp.broadcast_to(pn2_col[:, None], (P_pad, _LANE))   # padded rows never win mins

    kernel = functools.partial(_loss_kernel,
                               n_lane_chunks=n_lane_chunks,
                               n_p_chunks=n_p_chunks,
                               p_chunk=p_chunk)

    minx_out, stats_out = pl.pallas_call(
        kernel,
        out_shape=(jax.ShapeDtypeStruct((num_splits * P_pad, _LANE), jnp.float32),
                   jax.ShapeDtypeStruct((num_splits * 8, _LANE), jnp.float32)),
        grid_spec=pltpu.PrefetchScalarGridSpec(
            num_scalar_prefetch=0,
            grid=(num_splits, T),
            in_specs=[
                pl.BlockSpec((8, tile_s), lambda c, k: (0, c * T + k)),   # data slab
                pl.BlockSpec((P_pad, 8), lambda c, k: (0, 0)),            # -2*pred (resident)
                pl.BlockSpec((P_pad, _LANE), lambda c, k: (0, 0)),        # |pred|^2 (resident)
            ],
            out_specs=[
                pl.BlockSpec((P_pad, _LANE), lambda c, k: (c, 0)),        # per-core min acc
                pl.BlockSpec((8, _LANE), lambda c, k: (c, 0)),            # per-core sums
            ],
            scratch_shapes=[
                pltpu.VMEM((1, _LANE), jnp.float32),   # masked sum of gt->pred mins
                pltpu.VMEM((1, _LANE), jnp.float32),   # masked count
                pltpu.VMEM((1, _LANE), jnp.float32),   # masked uv L1 sum
            ]),
        compiler_params=pltpu.CompilerParams(
            dimension_semantics=("parallel", "arbitrary"),
            vmem_limit_bytes=vmem_limit_bytes),
    )(data, pred_neg2, pn2b)

    # ---- tiny cross-split / cross-lane combine in JAX ------------------------
    minx = jnp.min(minx_out.reshape(num_splits, P_pad, _LANE), axis=(0, 2))[:P]
    cham_x = jnp.mean(minx)
    stats = stats_out.reshape(num_splits, 8, _LANE)
    sumy = jnp.sum(stats[:, 0, :])
    cnt = jnp.sum(stats[:, 1, :])
    uvs = jnp.sum(stats[:, 2, :])
    # NOTE: like pytorch3d chamfer on an empty masked set, an all-false mask
    # yields a non-finite pt_loss (cnt == 0); no silent guard is added.
    cham_y = sumy / cnt
    pt_loss = cham_x + cham_y
    uv_loss = uvs / float(S)
    loss = pt_weight * pt_loss + fwd_weight * uv_loss
    return {'loss': loss, 'fwd_loss': uv_loss, 'pt_loss': pt_loss}


if __name__ == "__main__":
    key = jax.random.PRNGKey(0)
    B, N, P, D, C = 2, 128, 128, 3, 2
    k1, k2, k3, k4, k5 = jax.random.split(key, 5)

    object_mask = jax.random.uniform(k1, (B, N)) > 0.3             # bool mask
    uv_points = jax.random.uniform(k2, (B, N, C), dtype=jnp.float32)
    uv_gt = jax.random.uniform(k3, (B, N, C), dtype=jnp.float32)
    surf_points = jax.random.normal(k4, (1, P, D), dtype=jnp.float32)
    wc = jax.random.normal(k5, (B, N, D), dtype=jnp.float32)

    model_outputs = {'object_mask': object_mask, 'uv_points': uv_points,
                     'surf_points': surf_points}
    model_inputs = {'wc': wc}
    ground_truth = {'uv_gt': uv_gt}

    fwd_weight, pt_weight = 1.0, 0.5   # deterministic "module params"
    res = doc3d_uvstn_field_loss(model_outputs, model_inputs, ground_truth,
                                 fwd_weight=fwd_weight, pt_weight=pt_weight,
                                 loss_mode='l1', scinv_lambda=1.0)
    jax.block_until_ready(res)

    # pure-JAX reference for correctness.
    m = object_mask.reshape(-1)
    gt_flat = wc.reshape(-1, D)
    pred = surf_points.reshape(P, D)
    d2 = jnp.sum((pred[:, None, :] - gt_flat[None, :, :]) ** 2, axis=-1)
    cham_x = jnp.min(jnp.where(m[None, :], d2, _BIG), axis=1).mean()
    miny = jnp.min(d2, axis=0)
    cham_y = jnp.sum(jnp.where(m, miny, 0.0)) / jnp.sum(m)
    pt_loss_ref = cham_x + cham_y
    uv_abs = jnp.abs(uv_points - uv_gt).sum(-1).reshape(-1)
    uv_loss_ref = jnp.sum(jnp.where(m, uv_abs, 0.0)) / float(B * N)
    loss_ref = pt_weight * pt_loss_ref + fwd_weight * uv_loss_ref

    np.testing.assert_allclose(float(res['pt_loss']), float(pt_loss_ref),
                               rtol=5e-4, atol=1e-4)
    np.testing.assert_allclose(float(res['fwd_loss']), float(uv_loss_ref),
                               rtol=5e-4, atol=1e-4)
    np.testing.assert_allclose(float(res['loss']), float(loss_ref),
                               rtol=5e-4, atol=1e-4)
    print("KERNEL_OK")
</pallas_src>

<mosaic_0001>
module attributes {stable_mosaic.version = 11 : i64} {
  func.func @_loss_kernel(%arg0: i32, %arg1: i32, %arg2: memref<8x256xf32, #tpu.memory_space<vmem>>, %arg3: memref<128x8xf32, #tpu.memory_space<vmem>>, %arg4: memref<128x128xf32, #tpu.memory_space<vmem>>, %arg5: memref<128x128xf32, #tpu.memory_space<vmem>>, %arg6: memref<8x128xf32, #tpu.memory_space<vmem>>, %arg7: memref<1x128xf32, #tpu.memory_space<vmem>>, %arg8: memref<1x128xf32, #tpu.memory_space<vmem>>, %arg9: memref<1x128xf32, #tpu.memory_space<vmem>>) attributes {dimension_semantics = [#tpu.dimension_semantics<parallel>, #tpu.dimension_semantics<arbitrary>], iteration_bounds = array<i64: 1, 1>, scalar_prefetch = 0 : i64, scratch_operands = 3 : i64, tpu.core_type = #tpu.core_type<tc>, window_params = [{transform_indices = @transform_0, window_bounds = array<i64: 8, 256>}, {pipeline_mode = #tpu.pipeline_mode<synchronous>, transform_indices = @transform_1, window_bounds = array<i64: 128, 8>}, {pipeline_mode = #tpu.pipeline_mode<synchronous>, transform_indices = @transform_2, window_bounds = array<i64: 128, 128>}, {transform_indices = @transform_3, window_bounds = array<i64: 128, 128>}, {transform_indices = @transform_4, window_bounds = array<i64: 8, 128>}]} {
    %c0_i32 = arith.constant 0 : i32
    %0 = arith.cmpi eq, %arg1, %c0_i32 : i32
    %1 = arith.extui %0 : i1 to i32
    %c0_i32_0 = arith.constant 0 : i32
    %2 = arith.cmpi ne, %1, %c0_i32_0 : i32
    scf.if %2 {
      %cst_49 = arith.constant 1.000000e+30 : f32
      %90 = vector.broadcast %cst_49 : f32 to vector<128x128xf32>
      %c0_50 = arith.constant 0 : index
      %c0_51 = arith.constant 0 : index
      %91 = vector.load %arg5[%c0_50, %c0_51] : memref<128x128xf32, #tpu.memory_space<vmem>>, vector<128x128xf32>
      tpu.vector_store %arg5[%c0_50, %c0_51], %90 {strides = array<i32>} : memref<128x128xf32, #tpu.memory_space<vmem>>, vector<128x128xf32>,
      %cst_52 = arith.constant 0.000000e+00 : f32
      %92 = vector.broadcast %cst_52 : f32 to vector<1x128xf32>
      %c0_53 = arith.constant 0 : index
      %c0_54 = arith.constant 0 : index
      %93 = vector.load %arg7[%c0_53, %c0_54] : memref<1x128xf32, #tpu.memory_space<vmem>>, vector<1x128xf32>
      tpu.vector_store %arg7[%c0_53, %c0_54], %92 {strides = array<i32>} : memref<1x128xf32, #tpu.memory_space<vmem>>, vector<1x128xf32>,
      %cst_55 = arith.constant 0.000000e+00 : f32
      %94 = vector.broadcast %cst_55 : f32 to vector<1x128xf32>
      %c0_56 = arith.constant 0 : index
      %c0_57 = arith.constant 0 : index
      %95 = vector.load %arg8[%c0_56, %c0_57] : memref<1x128xf32, #tpu.memory_space<vmem>>, vector<1x128xf32>
      tpu.vector_store %arg8[%c0_56, %c0_57], %94 {strides = array<i32>} : memref<1x128xf32, #tpu.memory_space<vmem>>, vector<1x128xf32>,
      %cst_58 = arith.constant 0.000000e+00 : f32
      %96 = vector.broadcast %cst_58 : f32 to vector<1x128xf32>
      %c0_59 = arith.constant 0 : index
      %c0_60 = arith.constant 0 : index
      %97 = vector.load %arg9[%c0_59, %c0_60] : memref<1x128xf32, #tpu.memory_space<vmem>>, vector<1x128xf32>
      tpu.vector_store %arg9[%c0_59, %c0_60], %96 {strides = array<i32>} : memref<1x128xf32, #tpu.memory_space<vmem>>, vector<1x128xf32>,
    } else {
    }
    %cst = arith.constant 0.000000e+00 : f32
    %3 = vector.broadcast %cst : f32 to vector<1x128xf32>
    %cst_1 = arith.constant 0.000000e+00 : f32
    %4 = vector.broadcast %cst_1 : f32 to vector<1x128xf32>
    %cst_2 = arith.constant 0.000000e+00 : f32
    %5 = vector.broadcast %cst_2 : f32 to vector<1x128xf32>
    %c0 = arith.constant 0 : index
    %c0_3 = arith.constant 0 : index
    %6 = vector.load %arg2[%c0, %c0_3] : memref<8x256xf32, #tpu.memory_space<vmem>>, vector<8x128xf32>
    %7 = vector.extract_strided_slice %6 {offsets = [0, 0], sizes = [3, 128], strides = [1, 1]} : vector<8x128xf32> to vector<3x128xf32>
    %8 = vector.extract_strided_slice %6 {offsets = [3, 0], sizes = [1, 128], strides = [1, 1]} : vector<8x128xf32> to vector<1x128xf32>
    %9 = vector.extract_strided_slice %6 {offsets = [4, 0], sizes = [2, 128], strides = [1, 1]} : vector<8x128xf32> to vector<2x128xf32>
    %10 = vector.extract_strided_slice %6 {offsets = [6, 0], sizes = [2, 128], strides = [1, 1]} : vector<8x128xf32> to vector<2x128xf32>
    %11 = arith.mulf %7, %7 : vector<3x128xf32>
    %cst_4 = arith.constant dense<0.000000e+00> : vector<128xf32>
    %12 = vector.multi_reduction <add>, %11, %cst_4 [0] : vector<3x128xf32> to vector<128xf32>
    %13 = vector.shape_cast %12 : vector<128xf32> to vector<1x128xf32>
    %cst_5 = arith.constant 1.000000e+00 : f32
    %14 = vector.broadcast %cst_5 : f32 to vector<1x128xf32>
    %15 = arith.subf %14, %8 : vector<1x128xf32>
    %cst_6 = arith.constant 1.000000e+30 : f32
    %16 = vector.broadcast %cst_6 : f32 to vector<1x128xf32>
    %17 = arith.mulf %15, %16 : vector<1x128xf32>
    %c0_7 = arith.constant 0 : index
    %c0_8 = arith.constant 0 : index
    %18 = vector.load %arg3[%c0_7, %c0_8] : memref<128x8xf32, #tpu.memory_space<vmem>>, vector<128x8xf32>
    %cst_9 = arith.constant dense<0.000000e+00> : vector<128x128xf32>
    %19 = tpu.matmul %18, %6, %cst_9 {dimension_numbers = #tpu.dot_dimension_numbers<[1], [0], [0], [1], [0, 0, 1, 1], [], []>, precision = #tpu.contract_precision<fp32>} : vector<128x8xf32>, vector<8x128xf32>, vector<128x128xf32> -> vector<128x128xf32>
    %c0_10 = arith.constant 0 : index
    %c0_11 = arith.constant 0 : index
    %20 = vector.load %arg4[%c0_10, %c0_11] : memref<128x128xf32, #tpu.memory_space<vmem>>, vector<128x128xf32>
    %21 = vector.broadcast %13 : vector<1x128xf32> to vector<128x128xf32>
    %22 = arith.addf %21, %19 : vector<128x128xf32>
    %23 = arith.addf %20, %22 : vector<128x128xf32>
    %cst_12 = arith.constant 0.000000e+00 : f32
    %24 = vector.broadcast %cst_12 : f32 to vector<128x128xf32>
    %25 = arith.maximumf %23, %24 : vector<128x128xf32>
    %c0_13 = arith.constant 0 : index
    %c0_14 = arith.constant 0 : index
    %26 = vector.load %arg5[%c0_13, %c0_14] : memref<128x128xf32, #tpu.memory_space<vmem>>, vector<128x128xf32>
    %27 = vector.broadcast %17 : vector<1x128xf32> to vector<128x128xf32>
    %28 = arith.addf %25, %27 : vector<128x128xf32>
    %29 = arith.minimumf %26, %28 : vector<128x128xf32>
    %c0_15 = arith.constant 0 : index
    %c0_16 = arith.constant 0 : index
    %30 = vector.load %arg5[%c0_15, %c0_16] : memref<128x128xf32, #tpu.memory_space<vmem>>, vector<128x128xf32>
    tpu.vector_store %arg5[%c0_15, %c0_16], %29 {strides = array<i32>} : memref<128x128xf32, #tpu.memory_space<vmem>>, vector<128x128xf32>,
    %cst_17 = arith.constant dense<0x7F800000> : vector<128xf32>
    %31 = vector.multi_reduction <minimumf>, %25, %cst_17 [0] : vector<128x128xf32> to vector<128xf32>
    %32 = vector.shape_cast %31 : vector<128xf32> to vector<1x128xf32>
    %33 = arith.mulf %32, %8 : vector<1x128xf32>
    %34 = arith.addf %3, %33 : vector<1x128xf32>
    %35 = arith.addf %4, %8 : vector<1x128xf32>
    %36 = arith.subf %9, %10 : vector<2x128xf32>
    %37 = math.absf %36 : vector<2x128xf32>
    %cst_18 = arith.constant dense<0.000000e+00> : vector<128xf32>
    %38 = vector.multi_reduction <add>, %37, %cst_18 [0] : vector<2x128xf32> to vector<128xf32>
    %39 = vector.shape_cast %38 : vector<128xf32> to vector<1x128xf32>
    %40 = arith.mulf %39, %8 : vector<1x128xf32>
    %41 = arith.addf %5, %40 : vector<1x128xf32>
    %c0_19 = arith.constant 0 : index
    %c128 = arith.constant 128 : index
    %42 = vector.load %arg2[%c0_19, %c128] : memref<8x256xf32, #tpu.memory_space<vmem>>, vector<8x128xf32>
    %43 = vector.extract_strided_slice %42 {offsets = [0, 0], sizes = [3, 128], strides = [1, 1]} : vector<8x128xf32> to vector<3x128xf32>
    %44 = vector.extract_strided_slice %42 {offsets = [3, 0], sizes = [1, 128], strides = [1, 1]} : vector<8x128xf32> to vector<1x128xf32>
    %45 = vector.extract_strided_slice %42 {offsets = [4, 0], sizes = [2, 128], strides = [1, 1]} : vector<8x128xf32> to vector<2x128xf32>
    %46 = vector.extract_strided_slice %42 {offsets = [6, 0], sizes = [2, 128], strides = [1, 1]} : vector<8x128xf32> to vector<2x128xf32>
    %47 = arith.mulf %43, %43 : vector<3x128xf32>
    %cst_20 = arith.constant dense<0.000000e+00> : vector<128xf32>
    %48 = vector.multi_reduction <add>, %47, %cst_20 [0] : vector<3x128xf32> to vector<128xf32>
    %49 = vector.shape_cast %48 : vector<128xf32> to vector<1x128xf32>
    %cst_21 = arith.constant 1.000000e+00 : f32
    %50 = vector.broadcast %cst_21 : f32 to vector<1x128xf32>
    %51 = arith.subf %50, %44 : vector<1x128xf32>
    %cst_22 = arith.constant 1.000000e+30 : f32
    %52 = vector.broadcast %cst_22 : f32 to vector<1x128xf32>
    %53 = arith.mulf %51, %52 : vector<1x128xf32>
    %c0_23 = arith.constant 0 : index
    %c0_24 = arith.constant 0 : index
    %54 = vector.load %arg3[%c0_23, %c0_24] : memref<128x8xf32, #tpu.memory_space<vmem>>, vector<128x8xf32>
    %cst_25 = arith.constant dense<0.000000e+00> : vector<128x128xf32>
    %55 = tpu.matmul %54, %42, %cst_25 {dimension_numbers = #tpu.dot_dimension_numbers<[1], [0], [0], [1], [0, 0, 1, 1], [], []>, precision = #tpu.contract_precision<fp32>} : vector<128x8xf32>, vector<8x128xf32>, vector<128x128xf32> -> vector<128x128xf32>
    %c0_26 = arith.constant 0 : index
    %c0_27 = arith.constant 0 : index
    %56 = vector.load %arg4[%c0_26, %c0_27] : memref<128x128xf32, #tpu.memory_space<vmem>>, vector<128x128xf32>
    %57 = vector.broadcast %49 : vector<1x128xf32> to vector<128x128xf32>
    %58 = arith.addf %57, %55 : vector<128x128xf32>
    %59 = arith.addf %56, %58 : vector<128x128xf32>
    %cst_28 = arith.constant 0.000000e+00 : f32
    %60 = vector.broadcast %cst_28 : f32 to vector<128x128xf32>
    %61 = arith.maximumf %59, %60 : vector<128x128xf32>
    %c0_29 = arith.constant 0 : index
    %c0_30 = arith.constant 0 : index
    %62 = vector.load %arg5[%c0_29, %c0_30] : memref<128x128xf32, #tpu.memory_space<vmem>>, vector<128x128xf32>
    %63 = vector.broadcast %53 : vector<1x128xf32> to vector<128x128xf32>
    %64 = arith.addf %61, %63 : vector<128x128xf32>
    %65 = arith.minimumf %62, %64 : vector<128x128xf32>
    %c0_31 = arith.constant 0 : index
    %c0_32 = arith.constant 0 : index
    %66 = vector.load %arg5[%c0_31, %c0_32] : memref<128x128xf32, #tpu.memory_space<vmem>>, vector<128x128xf32>
    tpu.vector_store %arg5[%c0_31, %c0_32], %65 {strides = array<i32>} : memref<128x128xf32, #tpu.memory_space<vmem>>, vector<128x128xf32>,
    %cst_33 = arith.constant dense<0x7F800000> : vector<128xf32>
    %67 = vector.multi_reduction <minimumf>, %61, %cst_33 [0] : vector<128x128xf32> to vector<128xf32>
    %68 = vector.shape_cast %67 : vector<128xf32> to vector<1x128xf32>
    %69 = arith.mulf %68, %44 : vector<1x128xf32>
    %70 = arith.addf %34, %69 : vector<1x128xf32>
    %71 = arith.addf %35, %44 : vector<1x128xf32>
    %72 = arith.subf %45, %46 : vector<2x128xf32>
    %73 = math.absf %72 : vector<2x128xf32>
    %cst_34 = arith.constant dense<0.000000e+00> : vector<128xf32>
    %74 = vector.multi_reduction <add>, %73, %cst_34 [0] : vector<2x128xf32> to vector<128xf32>
    %75 = vector.shape_cast %74 : vector<128xf32> to vector<1x128xf32>
    %76 = arith.mulf %75, %44 : vector<1x128xf32>
    %77 = arith.addf %41, %76 : vector<1x128xf32>
    %c0_35 = arith.constant 0 : index
    %c0_36 = arith.constant 0 : index
    %78 = vector.load %arg7[%c0_35, %c0_36] : memref<1x128xf32, #tpu.memory_space<vmem>>, vector<1x128xf32>
    %79 = arith.addf %78, %70 : vector<1x128xf32>
    %c0_37 = arith.constant 0 : index
    %c0_38 = arith.constant 0 : index
    %80 = vector.load %arg7[%c0_37, %c0_38] : memref<1x128xf32, #tpu.memory_space<vmem>>, vector<1x128xf32>
    tpu.vector_store %arg7[%c0_37, %c0_38], %79 {strides = array<i32>} : memref<1x128xf32, #tpu.memory_space<vmem>>, vector<1x128xf32>,
    %c0_39 = arith.constant 0 : index
    %c0_40 = arith.constant 0 : index
    %81 = vector.load %arg8[%c0_39, %c0_40] : memref<1x128xf32, #tpu.memory_space<vmem>>, vector<1x128xf32>
    %82 = arith.addf %81, %71 : vector<1x128xf32>
    %c0_41 = arith.constant 0 : index
    %c0_42 = arith.constant 0 : index
    %83 = vector.load %arg8[%c0_41, %c0_42] : memref<1x128xf32, #tpu.memory_space<vmem>>, vector<1x128xf32>
    tpu.vector_store %arg8[%c0_41, %c0_42], %82 {strides = array<i32>} : memref<1x128xf32, #tpu.memory_space<vmem>>, vector<1x128xf32>,
    %c0_43 = arith.constant 0 : index
    %c0_44 = arith.constant 0 : index
    %84 = vector.load %arg9[%c0_43, %c0_44] : memref<1x128xf32, #tpu.memory_space<vmem>>, vector<1x128xf32>
    %85 = arith.addf %84, %77 : vector<1x128xf32>
    %c0_45 = arith.constant 0 : index
    %c0_46 = arith.constant 0 : index
    %86 = vector.load %arg9[%c0_45, %c0_46] : memref<1x128xf32, #tpu.memory_space<vmem>>, vector<1x128xf32>
    tpu.vector_store %arg9[%c0_45, %c0_46], %85 {strides = array<i32>} : memref<1x128xf32, #tpu.memory_space<vmem>>, vector<1x128xf32>,
    %c0_i32_47 = arith.constant 0 : i32
    %87 = arith.cmpi eq, %arg1, %c0_i32_47 : i32
    %88 = arith.extui %87 : i1 to i32
    %c0_i32_48 = arith.constant 0 : i32
    %89 = arith.cmpi ne, %88, %c0_i32_48 : i32
    scf.if %89 {
      %c0_49 = arith.constant 0 : index
      %c0_50 = arith.constant 0 : index
      %90 = vector.load %arg7[%c0_49, %c0_50] : memref<1x128xf32, #tpu.memory_space<vmem>>, vector<1x128xf32>
      %c0_51 = arith.constant 0 : index
      %c0_52 = arith.constant 0 : index
      %91 = vector.load %arg6[%c0_51, %c0_52] : memref<8x128xf32, #tpu.memory_space<vmem>>, vector<1x128xf32>
      tpu.vector_store %arg6[%c0_51, %c0_52], %90 {strides = array<i32>} : memref<8x128xf32, #tpu.memory_space<vmem>>, vector<1x128xf32>,
      %c0_53 = arith.constant 0 : index
      %c0_54 = arith.constant 0 : index
      %92 = vector.load %arg8[%c0_53, %c0_54] : memref<1x128xf32, #tpu.memory_space<vmem>>, vector<1x128xf32>
      %c1 = arith.constant 1 : index
      %c0_55 = arith.constant 0 : index
      %93 = vector.load %arg6[%c1, %c0_55] : memref<8x128xf32, #tpu.memory_space<vmem>>, vector<1x128xf32>
      tpu.vector_store %arg6[%c1, %c0_55], %92 {strides = array<i32>} : memref<8x128xf32, #tpu.memory_space<vmem>>, vector<1x128xf32>,
      %c0_56 = arith.constant 0 : index
      %c0_57 = arith.constant 0 : index
      %94 = vector.load %arg9[%c0_56, %c0_57] : memref<1x128xf32, #tpu.memory_space<vmem>>, vector<1x128xf32>
      %c2 = arith.constant 2 : index
      %c0_58 = arith.constant 0 : index
      %95 = vector.load %arg6[%c2, %c0_58] : memref<8x128xf32, #tpu.memory_space<vmem>>, vector<1x128xf32>
      tpu.vector_store %arg6[%c2, %c0_58], %94 {strides = array<i32>} : memref<8x128xf32, #tpu.memory_space<vmem>>, vector<1x128xf32>,
      %cst_59 = arith.constant 0.000000e+00 : f32
      %96 = vector.broadcast %cst_59 : f32 to vector<5x128xf32>
      %c3 = arith.constant 3 : index
      %c0_60 = arith.constant 0 : index
      %97 = vector.load %arg6[%c3, %c0_60] : memref<8x128xf32, #tpu.memory_space<vmem>>, vector<5x128xf32>
      tpu.vector_store %arg6[%c3, %c0_60], %96 {strides = array<i32>} : memref<8x128xf32, #tpu.memory_space<vmem>>, vector<5x128xf32>,
    } else {
    }
    return
  }
  func.func @transform_0(%arg0: i32, %arg1: i32) -> (i32, i32) {
    %c1_i32 = arith.constant 1 : i32
    %0 = arith.muli %arg0, %c1_i32 : i32
    %1 = arith.addi %0, %arg1 : i32
    %c0_i32 = arith.constant 0 : i32
    %c0_i32_0 = arith.constant 0 : i32
    return %c0_i32, %1 : i32, i32
  }
  func.func @transform_1(%arg0: i32, %arg1: i32) -> (i32, i32) {
    %c0_i32 = arith.constant 0 : i32
    %c0_i32_0 = arith.constant 0 : i32
    %c0_i32_1 = arith.constant 0 : i32
    return %c0_i32, %c0_i32_0 : i32, i32
  }
  func.func @transform_2(%arg0: i32, %arg1: i32) -> (i32, i32) {
    %c0_i32 = arith.constant 0 : i32
    %c0_i32_0 = arith.constant 0 : i32
    %c0_i32_1 = arith.constant 0 : i32
    return %c0_i32, %c0_i32_0 : i32, i32
  }
  func.func @transform_3(%arg0: i32, %arg1: i32) -> (i32, i32) {
    %c0_i32 = arith.constant 0 : i32
    %c0_i32_0 = arith.constant 0 : i32
    return %arg0, %c0_i32 : i32, i32
  }
  func.func @transform_4(%arg0: i32, %arg1: i32) -> (i32, i32) {
    %c0_i32 = arith.constant 0 : i32
    %c0_i32_0 = arith.constant 0 : i32
    return %arg0, %c0_i32 : i32, i32
  }
}

</mosaic_0001>

<bundles_post_ra>
// kernel: tpu_custom_call.1
= control target key start
LH: loop header
LB: loop body
LE: loop exit
PB: predicated region body
PF: predicated region fallthrough
CT: control target
= control target key end

     0   :  { %10 = vsyncpa [#allocation6], 0  ;;  %s4323_s0 = inlined_call_operand.hbm [shape: f32[8,256], index: 0, kind: input, shape index: {}]   ;;  %s4324_s1 = inlined_call_operand.vmem [shape: f32[128,8], index: 1, kind: input, shape index: {}]   ;;  %s4325_s2 = inlined_call_operand.vmem [shape: f32[128,128], index: 2, kind: input, shape index: {}]   ;;  %s4326_s3 = inlined_call_operand.hbm [shape: f32[128,128], index: 3, kind: output, shape index: {0}]   ;;  %s4327_s4 = inlined_call_operand.hbm [shape: f32[8,128], index: 4, kind: output, shape index: {1}]  }
   0x1   :  { %11 = vsyncpa [#allocation7], 0 }
   0x2   :  { %12 = vsyncpa [#allocation10], 0  ;;  %s3602_s15 = smov [#allocation5]   ;;  %s3530_s19 = scalar_lea.hbm %s4323_s0, 256 }
   0x3   :  { %s23_s16 = sshll.u32 %s3602_s15, 4  ;;  %p3531_p0 = scmp.ne.s32.totalorder %s4323_s0, %s3530_s19  ;;  %s24_s16 = int_to_ptr.vmem [resolvable:$true] %s23_s16 }
   0x4   :  { %p3534_p1 = scmp.lt.u32.totalorder %s3530_s19, %s4323_s0 }
   0x6   :  { %p3536_p2 = pnand %p3534_p1, %p3531_p0 }
   0x8   :  { %3539 = shalt.err (!%p3536_p2)
}
   0x9   :  { %s3540_s24 = scalar_lea.vmem %s24_s16, 256  ;;  %p3545_p4 = scmp.lt.s32.totalorder %s24_s16, %s24_s16 }
   0xa   :  { %p3541_p3 = scmp.ne.s32.totalorder %s24_s16, %s3540_s24  ;;  %p3546_p5 = scmp.lt.s32.totalorder %s3540_s24, %s3540_s24 }
   0xc   :  { %p3547_p6 = por %p3546_p5, %p3545_p4 }
   0xe   :  { %p3548_p7 = pnand %p3547_p6, %p3541_p3 }
  0x10   :  { %3551 = shalt.err (!%p3548_p7)
}
  0x11   :  { %26 = dma.hbm_to_vmem [thread:$0]  %s4323_s0, 256, %s24_s16, [#allocation6]  }
  0x12   :  { %3596 = dma.done.wait [#allocation6], 256  }
  0x13   :  { %3597 = vsyncadd [#allocation6], 4294967040  ;;  %vm87_vm0 = vcmask 64512   ;;  %v3646_v0 = vld [vmem:[#allocation5] sm:$0xff]  ;;  %v3648_v1 = vld [vmem:[#allocation5 + $0x8] sm:$0xff]  ;;  %vm1391_vm1 = vcmask 1041408  }
  0x14   :  { %4332 = vst [vmem:[#allocation14_spill] sm:$0xff] %v3646_v0  ;;  %4333 = vst [vmem:[#allocation15_spill] sm:$0xff] %v3648_v1  ;;  %v71_v2 = vld [vmem:[%s4324_s1] sm:$0xff]  ;;  %v3654_v3 = vand.u32 4294901760, %v3646_v0  ;;  %v3657_v4 = vand.u32 4294901760, %v3648_v1  ;;  %v72_v6 = vld [vmem:[%s4324_s1 + $0x8] sm:$0xff] }
  0x15   :  { %v89_v5 = vsel %vm87_vm0, %v71_v2, 0  ;;  %v73_v7 = vld [vmem:[%s4324_s1 + $0x10] sm:$0xff]  ;;  %v74_v8 = vld [vmem:[%s4324_s1 + $0x18] sm:$0xff]  ;;  %v92_v10 = vsel %vm87_vm0, %v72_v6, 0  ;;  %v75_v13 = vld [vmem:[%s4324_s1 + $0x20] sm:$0xff]  ;;  %vm61_vm2 = vcmask 1042432  }
  0x16   :  { %v3669_v9 = vand.u32 4294901760, %v89_v5  ;;  %v95_v11 = vsel %vm87_vm0, %v73_v7, 0  ;;  %v98_v12 = vsel %vm87_vm0, %v74_v8, 0  ;;  %v76_v14 = vld [vmem:[%s4324_s1 + $0x28] sm:$0xff]  ;;  %3048 = vmatprep.subr.mxu0 %v3654_v3  ;;  %3204 = vmatprep.subr.mxu1 %v3657_v4  ;;  %v3684_v15 = vsub.f32 %v3646_v0, %v3654_v3  ;;  %v77_v39 = vld [vmem:[%s4324_s1 + $0x30] sm:$0xff]  ;;  %v78_v40 = vld [vmem:[%s4324_s1 + $0x38] sm:$0xff] }
  0x17   :  { %v3688_v16 = vsub.f32 %v3648_v1, %v3657_v4  ;;  %v3690_v17 = vand.u32 4294901760, %v92_v10  ;;  %v3692_v18 = vand.u32 4294901760, %v95_v11  ;;  %3049 = vmatpush3.msra.mxu0 %v3654_v3  ;;  %3205 = vmatpush3.msra.mxu1 %v3657_v4  ;;  %v3699_v20 = vand.u32 4294901760, %v98_v12  ;;  %v79_v49 = vld [vmem:[%s4324_s1 + $0x40] sm:$0xff]  ;;  %v80_v50 = vld [vmem:[%s4324_s1 + $0x48] sm:$0xff]  ;;  %v81_v51 = vld [vmem:[%s4324_s1 + $0x50] sm:$0xff] }
  0x18   :  { %v3697_v19 = vsub.f32 %v89_v5, %v3669_v9  ;;  %v101_v21 = vsel %vm87_vm0, %v75_v13, 0  ;;  %v104_v22 = vsel %vm87_vm0, %v76_v14, 0  ;;  %v3704_v23 = vand.u32 4294901760, %v3684_v15  ;;  %v82_v60 = vld [vmem:[%s4324_s1 + $0x58] sm:$0xff]  ;;  %v83_v5 = vld [vmem:[%s4324_s1 + $0x60] sm:$0xff] }
  0x19   :  { %v3707_v24 = vand.u32 4294901760, %v3688_v16  ;;  %v3710_v25 = vsub.f32 %v92_v10, %v3690_v17  ;;  %v3713_v26 = vsub.f32 %v95_v11, %v3692_v18  ;;  %v3719_v28 = vsub.f32 %v98_v12, %v3699_v20 }
  0x1a   :  { %v3716_v27 = vand.u32 4294901760, %v3697_v19  ;;  %v3721_v29 = vand.u32 4294901760, %v101_v21  ;;  %v3723_v30 = vand.u32 4294901760, %v104_v22  ;;  %v366_v31 = vsub.f32 %v3684_v15, %v3704_v23 }
  0x1b   :  { %v1706_v32 = vsub.f32 %v3688_v16, %v3707_v24  ;;  %v3730_v33 = vand.u32 4294901760, %v3710_v25  ;;  %v3733_v34 = vand.u32 4294901760, %v3713_v26  ;;  %v3738_v36 = vand.u32 4294901760, %v3719_v28 }
  0x1c   :  { %v205_v35 = vsub.f32 %v3697_v19, %v3716_v27  ;;  %v3741_v37 = vsub.f32 %v101_v21, %v3721_v29  ;;  %v3744_v38 = vsub.f32 %v104_v22, %v3723_v30  ;;  %v367_v41 = vand.u32 4294901760, %v366_v31  ;;  %v84_v21 = vld [vmem:[%s4324_s1 + $0x68] sm:$0xff] }
  0x1d   :  { %v1707_v42 = vand.u32 4294901760, %v1706_v32  ;;  %v215_v43 = vsub.f32 %v3710_v25, %v3730_v33  ;;  %v225_v44 = vsub.f32 %v3713_v26, %v3733_v34  ;;  %v235_v46 = vsub.f32 %v3719_v28, %v3738_v36 }
  0x1e   :  { %v206_v45 = vand.u32 4294901760, %v205_v35  ;;  %v3759_v47 = vand.u32 4294901760, %v3741_v37  ;;  %v3762_v48 = vand.u32 4294901760, %v3744_v38  ;;  %3074 = vmatprep.subr.mxu0 %v367_v41  ;;  %v107_v54 = vsel %vm87_vm0, %v77_v39, 0 }
  0x1f   :  { %3230 = vmatprep.subr.mxu1 %v1707_v42  ;;  %v216_v52 = vand.u32 4294901760, %v215_v43  ;;  %v226_v53 = vand.u32 4294901760, %v225_v44  ;;  %v110_v55 = vsel %vm87_vm0, %v78_v40, 0  ;;  %v236_v56 = vand.u32 4294901760, %v235_v46 }
  0x20   :  { %3050 = vmatprep.mubr.f32.mxu0 %v206_v45  ;;  %3206 = vmatprep.mubr.f32.mxu1 %v206_v45  ;;  %v245_v57 = vsub.f32 %v3741_v37, %v3759_v47  ;;  %v255_v58 = vsub.f32 %v3744_v38, %v3762_v48  ;;  %v3779_v59 = vand.u32 4294901760, %v107_v54  ;;  %v3784_v61 = vand.u32 4294901760, %v110_v55 }
  0x21   :  { %3051 = vmatmul.mubr.f32.vlgmr.msra.gmra.mrb[0].mxu0 %v216_v52  ;;  %3207 = vmatmul.mubr.f32.vlgmr.msra.gmra.mrb[0].mxu1 %v216_v52  ;;  %v113_v62 = vsel %vm87_vm0, %v79_v49, 0  ;;  %v116_v63 = vsel %vm87_vm0, %v80_v50, 0  ;;  %v119_v2 = vsel %vm87_vm0, %v81_v51, 0  ;;  %v122_v14 = vsel %vm87_vm0, %v82_v60, 0 }
  0x22   :  { %3075 = vmatpush3.msra.mxu0 %v367_v41  ;;  %3231 = vmatpush3.msra.mxu1 %v1707_v42  ;;  %v246_v6 = vand.u32 4294901760, %v245_v57  ;;  %v256_v7 = vand.u32 4294901760, %v255_v58  ;;  %v3793_v8 = vsub.f32 %v107_v54, %v3779_v59  ;;  %v3795_v10 = vand.u32 4294901760, %v113_v62 }
  0x23   :  { %3053 = vmatprep.mubr.f32.mxu0 %v226_v53  ;;  %3209 = vmatprep.mubr.f32.mxu1 %v226_v53  ;;  %v3798_v11 = vsub.f32 %v110_v55, %v3784_v61  ;;  %v3800_v12 = vand.u32 4294901760, %v116_v63  ;;  %v3802_v13 = vand.u32 4294901760, %v119_v2  ;;  %v3814_v32 = vand.u32 4294901760, %v122_v14  ;;  %v85_v53 = vld [vmem:[%s4324_s1 + $0x70] sm:$0xff] }
  0x24   :  { %v3809_v22 = vand.u32 4294901760, %v3793_v8  ;;  %v3812_v31 = vsub.f32 %v113_v62, %v3795_v10  ;;  %v125_v35 = vsel %vm87_vm0, %v83_v5, 0  ;;  %3100 = vmatprep.subr.mxu0 %v3684_v15  ;;  %3256 = vmatprep.subr.mxu1 %v3688_v16  ;;  %v128_v46 = vsel %vm87_vm0, %v84_v21, 0 }
  0x25   :  { %3054 = vmatmul.mubr.f32.gmra.mrb[2].mxu0 %v236_v56  ;;  %3210 = vmatmul.mubr.f32.gmra.mrb[2].mxu1 %v236_v56  ;;  %v3820_v39 = vand.u32 4294901760, %v3798_v11  ;;  %v3823_v40 = vsub.f32 %v116_v63, %v3800_v12  ;;  %v3826_v41 = vsub.f32 %v119_v2, %v3802_v13  ;;  %v3828_v42 = vand.u32 4294901760, %v125_v35  ;;  %v86_v63 = vld [vmem:[%s4324_s1 + $0x78] sm:$0xff] }
  0x26   :  { %3056 = vmatprep.mubr.f32.mxu0 %v246_v6  ;;  %3212 = vmatprep.mubr.f32.mxu1 %v246_v6  ;;  %v265_v43 = vsub.f32 %v3793_v8, %v3809_v22  ;;  %v3833_v44 = vand.u32 4294901760, %v3812_v31  ;;  %v3836_v45 = vsub.f32 %v122_v14, %v3814_v32  ;;  %v3858_v57 = vand.u32 4294901760, %v128_v46 }
  0x27   :  { %v275_v49 = vsub.f32 %v3798_v11, %v3820_v39  ;;  %v3842_v50 = vand.u32 4294901760, %v3823_v40  ;;  %v3845_v51 = vand.u32 4294901760, %v3826_v41  ;;  %v3848_v52 = vsub.f32 %v125_v35, %v3828_v42 }
  0x28   :  { %v266_v54 = vand.u32 4294901760, %v265_v43  ;;  %v285_v55 = vsub.f32 %v3812_v31, %v3833_v44  ;;  %v3856_v56 = vand.u32 4294901760, %v3836_v45  ;;  %v3871_v6 = vsub.f32 %v128_v46, %v3858_v57 }
  0x29   :  { %3057 = vmatmul.mubr.f32.gmra.mrb[4].mxu0 %v256_v7  ;;  %3213 = vmatmul.mubr.f32.gmra.mrb[4].mxu1 %v256_v7  ;;  %v276_v58 = vand.u32 4294901760, %v275_v49  ;;  %v295_v60 = vsub.f32 %v3823_v40, %v3842_v50  ;;  %v305_v62 = vsub.f32 %v3826_v41, %v3845_v51  ;;  %v3868_v5 = vand.u32 4294901760, %v3848_v52 }
  0x2a   :  { %3059 = vmatprep.mubr.f32.mxu0 %v266_v54  ;;  %3215 = vmatprep.mubr.f32.mxu1 %v266_v54  ;;  %v286_v2 = vand.u32 4294901760, %v285_v55  ;;  %v131_v7 = vsel %vm87_vm0, %v85_v53, 0  ;;  %v315_v21 = vsub.f32 %v3836_v45, %v3856_v56  ;;  %v134_v35 = vsel %vm87_vm0, %v86_v63, 0 }
  0x2b   :  { %v3874_v14 = vand.u32 4294901760, %v131_v7  ;;  %v296_v43 = vand.u32 4294901760, %v295_v60  ;;  %v3880_v49 = vand.u32 4294901760, %v3871_v6  ;;  %v3885_v46 = vand.u32 4294901760, %v134_v35 }
  0x2c   :  { %v306_v53 = vand.u32 4294901760, %v305_v62  ;;  %v325_v55 = vsub.f32 %v3848_v52, %v3868_v5  ;;  %v316_v60 = vand.u32 4294901760, %v315_v21 }
  0x2d   :  { %3060 = vmatmul.mubr.f32.gmra.mrb[6].mxu0 %v276_v58  ;;  %3216 = vmatmul.mubr.f32.gmra.mrb[6].mxu1 %v276_v58  ;;  %v3883_v54 = vsub.f32 %v131_v7, %v3874_v14  ;;  %v3893_v58 = vsub.f32 %v134_v35, %v3885_v46  ;;  %v335_v63 = vsub.f32 %v3871_v6, %v3880_v49 }
  0x2e   :  { %3062 = vmatprep.mubr.f32.mxu0 %v286_v2  ;;  %3218 = vmatprep.mubr.f32.mxu1 %v286_v2  ;;  %v326_v62 = vand.u32 4294901760, %v325_v55 }
  0x2f   :  { %v3890_v1 = vand.u32 4294901760, %v3883_v54  ;;  %v3898_v7 = vand.u32 4294901760, %v3893_v58  ;;  %v336_v0 = vand.u32 4294901760, %v335_v63 }
  0x31   :  { %3063 = vmatmul.mubr.f32.gmra.mrb[8].mxu0 %v296_v43  ;;  %3219 = vmatmul.mubr.f32.gmra.mrb[8].mxu1 %v296_v43  ;;  %v345_v2 = vsub.f32 %v3883_v54, %v3890_v1  ;;  %v355_v35 = vsub.f32 %v3893_v58, %v3898_v7 }
  0x32   :  { %3065 = vmatprep.mubr.f32.mxu0 %v306_v53  ;;  %3221 = vmatprep.mubr.f32.mxu1 %v306_v53 }
  0x33   :  { %v346_v21 = vand.u32 4294901760, %v345_v2  ;;  %v356_v43 = vand.u32 4294901760, %v355_v35 }
  0x35   :  { %3066 = vmatmul.mubr.f32.gmra.mrb[10].mxu0 %v316_v60  ;;  %3222 = vmatmul.mubr.f32.gmra.mrb[10].mxu1 %v316_v60 }
  0x36   :  { %3068 = vmatprep.mubr.f32.mxu0 %v326_v62  ;;  %3224 = vmatprep.mubr.f32.mxu1 %v326_v62 }
  0x39   :  { %3069 = vmatmul.mubr.f32.gmra.mrb[12].mxu0 %v336_v0  ;;  %3225 = vmatmul.mubr.f32.gmra.mrb[12].mxu1 %v336_v0  ;;  %v4334_v0 = vld [vmem:[#allocation14_spill] sm:$0xff] }
  0x3a   :  { %3071 = vmatprep.mubr.f32.mxu0 %v346_v21  ;;  %3227 = vmatprep.mubr.f32.mxu1 %v346_v21 }
  0x3d   :  { %3072 = vmatmul.mubr.f32.gmra.mrb[14].mxu0 %v356_v43  ;;  %3228 = vmatmul.mubr.f32.gmra.mrb[14].mxu1 %v356_v43  ;;  %v69_v43 = vsub.f32 1.0, %v4334_v0 }
  0x3e   :  { %3076 = vmatprep.mubr.f32.mxu0 %v3669_v9  ;;  %3232 = vmatprep.mubr.f32.mxu1 %v3669_v9 }
  0x41   :  { %3077 = vmatmul.mubr.f32.vlgmr.msra.gmra.mrb[0].mxu0 %v3690_v17  ;;  %3233 = vmatmul.mubr.f32.vlgmr.msra.gmra.mrb[0].mxu1 %v3690_v17 }
  0x42   :  { %3101 = vmatpush3.msra.mxu0 %v3684_v15  ;;  %3257 = vmatpush3.msra.mxu1 %v3688_v16 }
  0x43   :  { %3079 = vmatprep.mubr.f32.mxu0 %v3692_v18  ;;  %3235 = vmatprep.mubr.f32.mxu1 %v3692_v18 }
  0x44   :  { %3126 = vmatprep.subr.mxu0 %v3654_v3  ;;  %3282 = vmatprep.subr.mxu1 %v3657_v4 }
  0x45   :  { %3080 = vmatmul.mubr.f32.gmra.mrb[2].mxu0 %v3699_v20  ;;  %3236 = vmatmul.mubr.f32.gmra.mrb[2].mxu1 %v3699_v20 }
  0x46   :  { %3082 = vmatprep.mubr.f32.mxu0 %v3721_v29  ;;  %3238 = vmatprep.mubr.f32.mxu1 %v3721_v29 }
  0x49   :  { %3083 = vmatmul.mubr.f32.gmra.mrb[4].mxu0 %v3723_v30  ;;  %3239 = vmatmul.mubr.f32.gmra.mrb[4].mxu1 %v3723_v30 }
  0x4a   :  { %3085 = vmatprep.mubr.f32.mxu0 %v3779_v59  ;;  %3241 = vmatprep.mubr.f32.mxu1 %v3779_v59 }
  0x4d   :  { %3086 = vmatmul.mubr.f32.gmra.mrb[6].mxu0 %v3784_v61  ;;  %3242 = vmatmul.mubr.f32.gmra.mrb[6].mxu1 %v3784_v61 }
  0x4e   :  { %3088 = vmatprep.mubr.f32.mxu0 %v3795_v10  ;;  %3244 = vmatprep.mubr.f32.mxu1 %v3795_v10 }
  0x51   :  { %3089 = vmatmul.mubr.f32.gmra.mrb[8].mxu0 %v3800_v12  ;;  %3245 = vmatmul.mubr.f32.gmra.mrb[8].mxu1 %v3800_v12 }
  0x52   :  { %3091 = vmatprep.mubr.f32.mxu0 %v3802_v13  ;;  %3247 = vmatprep.mubr.f32.mxu1 %v3802_v13 }
  0x55   :  { %3092 = vmatmul.mubr.f32.gmra.mrb[10].mxu0 %v3814_v32  ;;  %3248 = vmatmul.mubr.f32.gmra.mrb[10].mxu1 %v3814_v32 }
  0x56   :  { %3094 = vmatprep.mubr.f32.mxu0 %v3828_v42  ;;  %3250 = vmatprep.mubr.f32.mxu1 %v3828_v42 }
  0x59   :  { %3095 = vmatmul.mubr.f32.gmra.mrb[12].mxu0 %v3858_v57  ;;  %3251 = vmatmul.mubr.f32.gmra.mrb[12].mxu1 %v3858_v57 }
  0x5a   :  { %3097 = vmatprep.mubr.f32.mxu0 %v3874_v14  ;;  %3253 = vmatprep.mubr.f32.mxu1 %v3874_v14 }
  0x5d   :  { %3098 = vmatmul.mubr.f32.gmra.mrb[14].mxu0 %v3885_v46  ;;  %3254 = vmatmul.mubr.f32.gmra.mrb[14].mxu1 %v3885_v46 }
  0x5e   :  { %3102 = vmatprep.mubr.f32.mxu0 %v3697_v19  ;;  %3258 = vmatprep.mubr.f32.mxu1 %v3697_v19 }
  0x61   :  { %3103 = vmatmul.mubr.f32.vlgmr.msra.gmra.mrb[0].mxu0 %v3710_v25  ;;  %3259 = vmatmul.mubr.f32.vlgmr.msra.gmra.mrb[0].mxu1 %v3710_v25 }
  0x62   :  { %3127 = vmatpush3.msra.mxu0 %v3654_v3  ;;  %3283 = vmatpush3.msra.mxu1 %v3657_v4 }
  0x63   :  { %3105 = vmatprep.mubr.f32.mxu0 %v3713_v26  ;;  %3261 = vmatprep.mubr.f32.mxu1 %v3713_v26 }
  0x64   :  { %3152 = vmatprep.subr.mxu0 %v3704_v23  ;;  %3308 = vmatprep.subr.mxu1 %v3707_v24 }
  0x65   :  { %3106 = vmatmul.mubr.f32.gmra.mrb[2].mxu0 %v3719_v28  ;;  %3262 = vmatmul.mubr.f32.gmra.mrb[2].mxu1 %v3719_v28 }
  0x66   :  { %3108 = vmatprep.mubr.f32.mxu0 %v3741_v37  ;;  %3264 = vmatprep.mubr.f32.mxu1 %v3741_v37 }
  0x69   :  { %3109 = vmatmul.mubr.f32.gmra.mrb[4].mxu0 %v3744_v38  ;;  %3265 = vmatmul.mubr.f32.gmra.mrb[4].mxu1 %v3744_v38  ;;  %v3603_v38 = vmov 1966171168  }
  0x6a   :  { %3111 = vmatprep.mubr.f32.mxu0 %v3793_v8  ;;  %3267 = vmatprep.mubr.f32.mxu1 %v3793_v8 }
  0x6d   :  { %3112 = vmatmul.mubr.f32.gmra.mrb[6].mxu0 %v3798_v11  ;;  %3268 = vmatmul.mubr.f32.gmra.mrb[6].mxu1 %v3798_v11 }
  0x6e   :  { %3114 = vmatprep.mubr.f32.mxu0 %v3812_v31  ;;  %3270 = vmatprep.mubr.f32.mxu1 %v3812_v31  ;;  %v3604_v31 = vmov 0.0  }
  0x6f   :  { %56 = vst [vmem:[#allocation2] sm:$0x1] %v3604_v31  ;;  %57 = vst [vmem:[#allocation3] sm:$0x1] %v3604_v31 }
  0x70   :  { %58 = vst [vmem:[#allocation4] sm:$0x1] %v3604_v31  ;;  %2812 = vst [vmem:[#allocation9 + $0x3] sm:$0x1f] %v3604_v31 }
  0x71   :  { %3115 = vmatmul.mubr.f32.gmra.mrb[8].mxu0 %v3823_v40  ;;  %3271 = vmatmul.mubr.f32.gmra.mrb[8].mxu1 %v3823_v40 }
  0x72   :  { %3117 = vmatprep.mubr.f32.mxu0 %v3826_v41  ;;  %3273 = vmatprep.mubr.f32.mxu1 %v3826_v41 }
  0x75   :  { %3118 = vmatmul.mubr.f32.gmra.mrb[10].mxu0 %v3836_v45  ;;  %3274 = vmatmul.mubr.f32.gmra.mrb[10].mxu1 %v3836_v45 }
  0x76   :  { %3120 = vmatprep.mubr.f32.mxu0 %v3848_v52  ;;  %3276 = vmatprep.mubr.f32.mxu1 %v3848_v52 }
  0x79   :  { %3121 = vmatmul.mubr.f32.gmra.mrb[12].mxu0 %v3871_v6  ;;  %3277 = vmatmul.mubr.f32.gmra.mrb[12].mxu1 %v3871_v6 }
  0x7a   :  { %3123 = vmatprep.mubr.f32.mxu0 %v3883_v54  ;;  %3279 = vmatprep.mubr.f32.mxu1 %v3883_v54 }
  0x7d   :  { %3124 = vmatmul.mubr.f32.gmra.mrb[14].mxu0 %v3893_v58  ;;  %3280 = vmatmul.mubr.f32.gmra.mrb[14].mxu1 %v3893_v58 }
  0x7e   :  { %3128 = vmatprep.mubr.f32.mxu0 %v3716_v27  ;;  %3284 = vmatprep.mubr.f32.mxu1 %v3716_v27 }
  0x81   :  { %3129 = vmatmul.mubr.f32.vlgmr.msra.gmra.mrb[0].mxu0 %v3730_v33  ;;  %3285 = vmatmul.mubr.f32.vlgmr.msra.gmra.mrb[0].mxu1 %v3730_v33 }
  0x82   :  { %3153 = vmatpush3.msra.mxu0 %v3704_v23  ;;  %3309 = vmatpush3.msra.mxu1 %v3707_v24 }
  0x83   :  { %3131 = vmatprep.mubr.f32.mxu0 %v3733_v34  ;;  %3287 = vmatprep.mubr.f32.mxu1 %v3733_v34  ;;  %v1307_v34 = vlaneseq }
  0x84   :  { %3178 = vmatprep.subr.mxu0 %v3654_v3  ;;  %3334 = vmatprep.subr.mxu1 %v3657_v4 }
  0x85   :  { %3132 = vmatmul.mubr.f32.gmra.mrb[2].mxu0 %v3738_v36  ;;  %3288 = vmatmul.mubr.f32.gmra.mrb[2].mxu1 %v3738_v36 }
  0x86   :  { %3134 = vmatprep.mubr.f32.mxu0 %v3759_v47  ;;  %3290 = vmatprep.mubr.f32.mxu1 %v3759_v47  ;;  %v2743_v47 = vunpack.c.l.s4 %v3603_v38  ;;  %v1230_v38 = vld [vmem:[%s4325_s2 + $0x18] sm:$0xff] }
  0x88   :  { %v2744_v8 = vunpack.c.0.s8 %v2743_v47 }
  0x89   :  { %3135 = vmatmul.mubr.f32.gmra.mrb[4].mxu0 %v3762_v48  ;;  %3291 = vmatmul.mubr.f32.gmra.mrb[4].mxu1 %v3762_v48 }
  0x8a   :  { %3137 = vmatprep.mubr.f32.mxu0 %v3809_v22  ;;  %3293 = vmatprep.mubr.f32.mxu1 %v3809_v22 }
  0x8d   :  { %3138 = vmatmul.mubr.f32.gmra.mrb[6].mxu0 %v3820_v39  ;;  %3294 = vmatmul.mubr.f32.gmra.mrb[6].mxu1 %v3820_v39 }
  0x8e   :  { %3140 = vmatprep.mubr.f32.mxu0 %v3833_v44  ;;  %3296 = vmatprep.mubr.f32.mxu1 %v3833_v44 }
  0x91   :  { %3141 = vmatmul.mubr.f32.gmra.mrb[8].mxu0 %v3842_v50  ;;  %3297 = vmatmul.mubr.f32.gmra.mrb[8].mxu1 %v3842_v50 }
  0x92   :  { %3143 = vmatprep.mubr.f32.mxu0 %v3845_v51  ;;  %3299 = vmatprep.mubr.f32.mxu1 %v3845_v51  ;;  %v2761_v51 = vld [vmem:[#allocation3] sm:$0x1] }
  0x95   :  { %3144 = vmatmul.mubr.f32.gmra.mrb[10].mxu0 %v3856_v56  ;;  %3300 = vmatmul.mubr.f32.gmra.mrb[10].mxu1 %v3856_v56  ;;  %v2782_v56 = vld [vmem:[#allocation4] sm:$0x1] }
  0x96   :  { %3146 = vmatprep.mubr.f32.mxu0 %v3868_v5  ;;  %3302 = vmatprep.mubr.f32.mxu1 %v3868_v5 }
  0x99   :  { %3147 = vmatmul.mubr.f32.gmra.mrb[12].mxu0 %v3880_v49  ;;  %3303 = vmatmul.mubr.f32.gmra.mrb[12].mxu1 %v3880_v49 }
  0x9a   :  { %3149 = vmatprep.mubr.f32.mxu0 %v3890_v1  ;;  %3305 = vmatprep.mubr.f32.mxu1 %v3890_v1  ;;  %v1384_v1 = vrot.slane %v4334_v0, 2 }
  0x9d   :  { %3150 = vmatmul.mubr.f32.gmra.mrb[14].mxu0 %v3898_v7  ;;  %3306 = vmatmul.mubr.f32.gmra.mrb[14].mxu1 %v3898_v7 }
  0x9e   :  { %3154 = vmatprep.mubr.f32.mxu0 %v3669_v9  ;;  %3310 = vmatprep.mubr.f32.mxu1 %v3669_v9 }
  0xa1   :  { %3155 = vmatmul.mubr.f32.vlgmr.msra.gmra.mrb[0].mxu0 %v3690_v17  ;;  %3311 = vmatmul.mubr.f32.vlgmr.msra.gmra.mrb[0].mxu1 %v3690_v17 }
  0xa2   :  { %3179 = vmatpush3.msra.mxu0 %v3654_v3  ;;  %3335 = vmatpush3.msra.mxu1 %v3657_v4  ;;  %v4335_v3 = vld [vmem:[#allocation15_spill] sm:$0xff] }
  0xa3   :  { %3157 = vmatprep.mubr.f32.mxu0 %v3692_v18  ;;  %3313 = vmatprep.mubr.f32.mxu1 %v3692_v18  ;;  %v2724_v4 = vrot.slane %v4335_v3, 2  ;;  %v1402_v49 = vmul.f32 %v4335_v3, %v4335_v3 }
  0xa5   :  { %3158 = vmatmul.mubr.f32.gmra.mrb[2].mxu0 %v3699_v20  ;;  %3314 = vmatmul.mubr.f32.gmra.mrb[2].mxu1 %v3699_v20  ;;  %v2726_v15 = vsub.f32 %v4335_v3, %v2724_v4 }
  0xa6   :  { %3160 = vmatprep.mubr.f32.mxu0 %v3721_v29  ;;  %3316 = vmatprep.mubr.f32.mxu1 %v3721_v29 }
  0xa9   :  { %3161 = vmatmul.mubr.f32.gmra.mrb[4].mxu0 %v3723_v30  ;;  %3317 = vmatmul.mubr.f32.gmra.mrb[4].mxu1 %v3723_v30 }
  0xaa   :  { %3163 = vmatprep.mubr.f32.mxu0 %v3779_v59  ;;  %3319 = vmatprep.mubr.f32.mxu1 %v3779_v59 }
  0xad   :  { %3164 = vmatmul.mubr.f32.gmra.mrb[6].mxu0 %v3784_v61  ;;  %3320 = vmatmul.mubr.f32.gmra.mrb[6].mxu1 %v3784_v61 }
  0xae   :  { %3166 = vmatprep.mubr.f32.mxu0 %v3795_v10  ;;  %3322 = vmatprep.mubr.f32.mxu1 %v3795_v10 }
  0xb1   :  { %3167 = vmatmul.mubr.f32.gmra.mrb[8].mxu0 %v3800_v12  ;;  %3323 = vmatmul.mubr.f32.gmra.mrb[8].mxu1 %v3800_v12 }
  0xb2   :  { %3169 = vmatprep.mubr.f32.mxu0 %v3802_v13  ;;  %3325 = vmatprep.mubr.f32.mxu1 %v3802_v13 }
  0xb5   :  { %3170 = vmatmul.mubr.f32.gmra.mrb[10].mxu0 %v3814_v32  ;;  %3326 = vmatmul.mubr.f32.gmra.mrb[10].mxu1 %v3814_v32 }
  0xb6   :  { %3172 = vmatprep.mubr.f32.mxu0 %v3828_v42  ;;  %3328 = vmatprep.mubr.f32.mxu1 %v3828_v42 }
  0xb9   :  { %3173 = vmatmul.mubr.f32.gmra.mrb[12].mxu0 %v3858_v57  ;;  %3329 = vmatmul.mubr.f32.gmra.mrb[12].mxu1 %v3858_v57 }
  0xba   :  { %3175 = vmatprep.mubr.f32.mxu0 %v3874_v14  ;;  %3331 = vmatprep.mubr.f32.mxu1 %v3874_v14 }
  0xbd   :  { %3176 = vmatmul.mubr.f32.gmra.mrb[14].mxu0 %v3885_v46  ;;  %3332 = vmatmul.mubr.f32.gmra.mrb[14].mxu1 %v3885_v46 }
  0xbe   :  { %3180 = vmatprep.mubr.f32.mxu0 %v3669_v9  ;;  %3336 = vmatprep.mubr.f32.mxu1 %v3669_v9  ;;  %v1386_v9 = vsub.f32 %v4334_v0, %v1384_v1  ;;  %v1410_v1 = vsub.f32 1.0, %v4335_v3 }
  0xc0   :  { %v1387_v16 = vand.u32 2147483647, %v1386_v9 }
  0xc1   :  { %3181 = vmatmul.mubr.f32.vlgmr.msra.gmra.mrb[0].mxu0 %v3690_v17  ;;  %3337 = vmatmul.mubr.f32.vlgmr.msra.gmra.mrb[0].mxu1 %v3690_v17  ;;  %v2727_v17 = vand.u32 2147483647, %v2726_v15  ;;  %v70_v15 = vmul.f32 1e+30, %v69_v43 }
  0xc2   :  { %3183 = vmatprep.mubr.f32.mxu0 %v3692_v18  ;;  %3339 = vmatprep.mubr.f32.mxu1 %v3692_v18  ;;  %v1389_v18 = vrot.slane %v1387_v16, 4 }
  0xc3   :  { %v2729_v19 = vrot.slane %v2727_v17, 4  ;;  %v1411_v17 = vmul.f32 1e+30, %v1410_v1 }
  0xc5   :  { %3184 = vmatmul.mubr.f32.gmra.mrb[2].mxu0 %v3699_v20  ;;  %3340 = vmatmul.mubr.f32.gmra.mrb[2].mxu1 %v3699_v20  ;;  %v1392_v20 = vsel %vm1391_vm1, %v1389_v18, 0.0  ;;  %v2731_v23 = vsel %vm1391_vm1, %v2729_v19, 0.0  ;;  %v1228_v19 = vld [vmem:[%s4325_s2 + $0x8] sm:$0xff] }
  0xc6   :  { %3186 = vmatprep.mubr.f32.mxu0 %v3721_v29  ;;  %3342 = vmatprep.mubr.f32.mxu1 %v3721_v29  ;;  %v1393_v24 = vrot.slane %v1392_v20, 4  ;;  %v2732_v25 = vrot.slane %v2731_v23, 4 }
  0xc8   :  { %v1394_v26 = vadd.f32 %v1393_v24, %v1392_v20  ;;  %v2733_v27 = vadd.f32 %v2732_v25, %v2731_v23 }
  0xc9   :  { %3187 = vmatmul.mubr.f32.gmra.mrb[4].mxu0 %v3723_v30  ;;  %3343 = vmatmul.mubr.f32.gmra.mrb[4].mxu1 %v3723_v30 }
  0xca   :  { %3189 = vmatprep.mubr.f32.mxu0 %v3779_v59  ;;  %3345 = vmatprep.mubr.f32.mxu1 %v3779_v59  ;;  %v1395_v28 = vrot.slane %v1394_v26, 2  ;;  %v2734_v29 = vrot.slane %v2733_v27, 2 }
  0xcc   :  { %v1396_v30 = vadd.f32 %v1395_v28, %v1394_v26  ;;  %v2735_v33 = vadd.f32 %v2734_v29, %v2733_v27 }
  0xcd   :  { %3190 = vmatmul.mubr.f32.gmra.mrb[6].mxu0 %v3784_v61  ;;  %3346 = vmatmul.mubr.f32.gmra.mrb[6].mxu1 %v3784_v61  ;;  %v4082_v61 = vshrl.u32 %v1307_v34, 7 }
  0xce   :  { %3192 = vmatprep.mubr.f32.mxu0 %v3795_v10  ;;  %3348 = vmatprep.mubr.f32.mxu1 %v3795_v10  ;;  %v1397_v36 = vrot.slane %v1396_v30, 1  ;;  %v2736_v37 = vrot.slane %v2735_v33, 1 }
  0xcf   :  { %v1309_v16 = vsub.s32 3, %v4082_v61 }
  0xd0   :  { %v1398_v48 = vadd.f32 %v1397_v36, %v1396_v30  ;;  %v2737_v59 = vadd.f32 %v2736_v37, %v2735_v33 }
  0xd1   :  { %3193 = vmatmul.mubr.f32.gmra.mrb[8].mxu0 %v3800_v12  ;;  %3349 = vmatmul.mubr.f32.gmra.mrb[8].mxu1 %v3800_v12  ;;  %v4087_v12 = vsub.s32 %v2744_v8, %v4082_v61  ;;  %v4118_v29 = vrot.slane %v70_v15, %v1309_v16  ;;  %v4122_v33 = vrot.slane %v1411_v17, %v1309_v16  ;;  %v1231_v16 = vld [vmem:[%s4325_s2 + $0x20] sm:$0xff] }
  0xd2   :  { %3195 = vmatprep.mubr.f32.mxu0 %v3802_v13  ;;  %3351 = vmatprep.mubr.f32.mxu1 %v3802_v13  ;;  %v1399_v10 = vmul.f32 %v1398_v48, %v4334_v0  ;;  %v2738_v11 = vmul.f32 %v2737_v59, %v4335_v3  ;;  %v2722_v13 = vadd.f32 %v4335_v3, %v4334_v0  ;;  %v1227_v3 = vld [vmem:[%s4325_s2] sm:$0xff] }
  0xd4   :  { %v2739_v22 = vadd.f32 %v2738_v11, %v1399_v10  ;;  %v1229_v11 = vld [vmem:[%s4325_s2 + $0x10] sm:$0xff] }
  0xd5   :  { %3196 = vmatmul.mubr.f32.gmra.mrb[10].mxu0 %v3814_v32  ;;  %3352 = vmatmul.mubr.f32.gmra.mrb[10].mxu1 %v3814_v32  ;;  %v2769_v32 = vrot.slane %v2722_v13, %v4087_v12 }
  0xd6   :  { %3198 = vmatprep.mubr.f32.mxu0 %v3828_v42  ;;  %3354 = vmatprep.mubr.f32.mxu1 %v3828_v42  ;;  %v2790_v39 = vrot.slane %v2739_v22, %v4087_v12 }
  0xd7   :  { %v2770_v40 = vcombine.high %v2769_v32, %v2769_v32 }
  0xd8   :  { %v2791_v41 = vcombine.high %v2790_v39, %v2790_v39 }
  0xd9   :  { %3199 = vmatmul.mubr.f32.gmra.mrb[12].mxu0 %v3858_v57  ;;  %3355 = vmatmul.mubr.f32.gmra.mrb[12].mxu1 %v3858_v57  ;;  %v2777_v42 = vrot.slane %v2770_v40, %v4087_v12 }
  0xda   :  { %3201 = vmatprep.mubr.f32.mxu0 %v3874_v14  ;;  %3357 = vmatprep.mubr.f32.mxu1 %v3874_v14  ;;  %v2798_v44 = vrot.slane %v2791_v41, %v4087_v12  ;;  %v60_v14 = vmul.f32 %v4334_v0, %v4334_v0 }
  0xdb   :  { %v2778_v45 = vcombine.high %v2777_v42, %v2777_v42 }
  0xdc   :  { %v2799_v50 = vcombine.high %v2798_v44, %v2798_v44  ;;  %v62_v54 = vsel %vm61_vm2, %v60_v14, 0.0 }
  0xdd   :  { %3202 = vmatmul.mubr.f32.gmra.mrb[14].mxu0 %v3885_v46  ;;  %3358 = vmatmul.mubr.f32.gmra.mrb[14].mxu1 %v3885_v46  ;;  %v2780_v52 = vadd.f32 %v2778_v45, %v2761_v51  ;;  %v1403_v46 = vsel %vm61_vm2, %v1402_v49, 0.0  ;;  %v63_v53 = vrot.slane %v62_v54, 4 }
  0xde   :  { %v2801_v57 = vadd.f32 %v2799_v50, %v2782_v56  ;;  %v1404_v55 = vrot.slane %v1403_v46, 4 }
  0xdf   :  { %2781 = vst [vmem:[#allocation3] sm:$0x1] %v2780_v52  ;;  %v64_v58 = vadd.f32 %v63_v53, %v62_v54 }
  0xe0   :  { %2802 = vst [vmem:[#allocation4] sm:$0x1] %v2801_v57  ;;  %v1405_v60 = vadd.f32 %v1404_v55, %v1403_v46  ;;  %v1232_v57 = vld [vmem:[%s4325_s2 + $0x28] sm:$0xff] }
  0xe1   :  { %v65_v63 = vrot.slane %v64_v58, 2 }
  0xe2   :  { %v1406_v7 = vrot.slane %v1405_v60, 2 }
  0xe3   :  { %v66_v62 = vadd.f32 %v65_v63, %v64_v58 }
  0xe4   :  { %v1407_v2 = vadd.f32 %v1406_v7, %v1405_v60 }
  0xe5   :  { %v67_v35 = vrot.slane %v66_v62, 1 }
  0xe6   :  { %v2808_v5 = vld [vmem:[#allocation3] sm:$0x1]  ;;  %v1408_v21 = vrot.slane %v1407_v2, 1 }
  0xe7   :  { %2809 = vst [vmem:[#allocation9 + $0x1] sm:$0x1] %v2808_v5  ;;  %v2810_v6 = vld [vmem:[#allocation4] sm:$0x1]  ;;  %v4101_v4 = vadd.f32 %v67_v35, %v66_v62 }
  0xe8   :  { %2811 = vst [vmem:[#allocation9 + $0x2] sm:$0x1] %v2810_v6  ;;  %v4103_v9 = vadd.f32 %v1408_v21, %v1407_v2 }
 0x194   :  { %v3182_v18 = vpop.f32.mrb[0].mxu0  ;;  %v3338_v20 = vpop.f32.mrb[0].mxu1 }
 0x195   :  { %v1244_v23 = vadd.f32 %v3182_v18, %v4101_v4  ;;  %v2584_v0 = vadd.f32 %v3338_v20, %v4103_v9  ;;  %v1133_v24 = vpop.f32.mrb[1].mxu0  ;;  %v2473_v25 = vpop.f32.mrb[1].mxu1 }
 0x196   :  { %v1243_v26 = vadd.f32 %v1133_v24, %v4101_v4  ;;  %v2583_v27 = vadd.f32 %v2473_v25, %v4103_v9 }
 0x197   :  { %v4116_v28 = vadd.f32 %v1244_v23, %v1228_v19  ;;  %v4120_v30 = vadd.f32 %v2584_v0, %v1228_v19 }
 0x198   :  { %v4124_v34 = vadd.f32 %v1243_v26, %v1227_v3  ;;  %v4126_v36 = vadd.f32 %v2583_v27, %v1227_v3  ;;  %v3185_v37 = vpop.f32.mrb[2].mxu0  ;;  %v3341_v47 = vpop.f32.mrb[2].mxu1  ;;  %v1234_v27 = vld [vmem:[%s4325_s2 + $0x38] sm:$0xff] }
 0x199   :  { %v1276_v48 = vmax.f32 %v4116_v28, 0.0  ;;  %v2616_v59 = vmax.f32 %v4120_v30, 0.0  ;;  %v1246_v61 = vadd.f32 %v3185_v37, %v4101_v4  ;;  %v2586_v8 = vadd.f32 %v3341_v47, %v4103_v9  ;;  %v1145_v10 = vpop.f32.mrb[3].mxu0  ;;  %v2485_v13 = vpop.f32.mrb[3].mxu1 }
 0x19a   :  { %v1275_v22 = vmax.f32 %v4124_v34, 0.0  ;;  %v2615_v31 = vmax.f32 %v4126_v36, 0.0  ;;  %v1245_v32 = vadd.f32 %v1145_v10, %v4101_v4  ;;  %v2585_v39 = vadd.f32 %v2485_v13, %v4103_v9 }
 0x19b   :  { %v1312_v40 = vadd.f32 %v4118_v29, %v1276_v48  ;;  %v2652_v41 = vadd.f32 %v4122_v33, %v2616_v59  ;;  %v4144_v42 = vadd.f32 %v1246_v61, %v1230_v38  ;;  %v4146_v44 = vadd.f32 %v2586_v8, %v1230_v38 }
 0x19c   :  { %v1311_v45 = vadd.f32 %v4118_v29, %v1275_v22  ;;  %v2651_v50 = vadd.f32 %v4122_v33, %v2615_v31  ;;  %v4154_v51 = vadd.f32 %v1245_v32, %v1229_v11  ;;  %v4156_v52 = vadd.f32 %v2585_v39, %v1229_v11  ;;  %v3188_v56 = vpop.f32.mrb[4].mxu0  ;;  %v3344_v5 = vpop.f32.mrb[4].mxu1 }
 0x19d   :  { %v1328_v6 = vmin.f32 %v1312_v40, 1e+30  ;;  %v1278_v14 = vmax.f32 %v4144_v42, 0.0  ;;  %v2618_v49 = vmax.f32 %v4146_v44, 0.0  ;;  %v1248_v54 = vadd.f32 %v3188_v56, %v4101_v4  ;;  %v1157_v46 = vpop.f32.mrb[5].mxu0  ;;  %v2497_v53 = vpop.f32.mrb[5].mxu1 }
 0x19e   :  { %v1327_v55 = vmin.f32 %v1311_v45, 1e+30  ;;  %v1277_v58 = vmax.f32 %v4154_v51, 0.0  ;;  %v2617_v60 = vmax.f32 %v4156_v52, 0.0  ;;  %v2588_v63 = vadd.f32 %v3344_v5, %v4103_v9  ;;  %v1233_v56 = vld [vmem:[%s4325_s2 + $0x30] sm:$0xff]  ;;  %v1235_v42 = vld [vmem:[%s4325_s2 + $0x40] sm:$0xff] }
 0x19f   :  { %v2668_v7 = vmin.f32 %v1328_v6, %v2652_v41  ;;  %v1314_v62 = vadd.f32 %v4118_v29, %v1278_v14  ;;  %v2654_v2 = vadd.f32 %v4122_v33, %v2618_v49  ;;  %v1264_v35 = vadd.f32 %v1248_v54, %v1232_v57 }
 0x1a0   :  { %v2667_v21 = vmin.f32 %v1327_v55, %v2651_v50  ;;  %v1313_v43 = vadd.f32 %v4118_v29, %v1277_v58  ;;  %v2653_v1 = vadd.f32 %v4122_v33, %v2617_v60  ;;  %v2604_v15 = vadd.f32 %v2588_v63, %v1232_v57  ;;  %v3191_v17 = vpop.f32.mrb[6].mxu0  ;;  %v3347_v18 = vpop.f32.mrb[6].mxu1 }
 0x1a1   :  { %2684 = vst [vmem:[#allocation8 + $0x8] sm:$0xff] %v2668_v7  ;;  %v1330_v19 = vmin.f32 %v1314_v62, 1e+30  ;;  %v1280_v20 = vmax.f32 %v1264_v35, 0.0  ;;  %v1247_v23 = vadd.f32 %v1157_v46, %v4101_v4  ;;  %v2587_v0 = vadd.f32 %v2497_v53, %v4103_v9  ;;  %v1169_v24 = vpop.f32.mrb[7].mxu0  ;;  %v2509_v3 = vpop.f32.mrb[7].mxu1 }
 0x1a2   :  { %2683 = vst [vmem:[#allocation8] sm:$0xff] %v2667_v21  ;;  %v1329_v25 = vmin.f32 %v1313_v43, 1e+30  ;;  %v2620_v26 = vmax.f32 %v2604_v15, 0.0  ;;  %v1250_v28 = vadd.f32 %v3191_v17, %v4101_v4  ;;  %v2590_v30 = vadd.f32 %v3347_v18, %v4103_v9  ;;  %v1236_v7 = vld [vmem:[%s4325_s2 + $0x48] sm:$0xff] }
 0x1a3   :  { %v2670_v37 = vmin.f32 %v1330_v19, %v2654_v2  ;;  %v1316_v38 = vadd.f32 %v4118_v29, %v1280_v20  ;;  %v4190_v47 = vmin.f32 %v1276_v48, %v1280_v20  ;;  %v1263_v61 = vadd.f32 %v1247_v23, %v1231_v16 }
 0x1a4   :  { %v2669_v8 = vmin.f32 %v1329_v25, %v2653_v1  ;;  %v2656_v10 = vadd.f32 %v4122_v33, %v2620_v26  ;;  %v4193_v11 = vmin.f32 %v2616_v59, %v2620_v26  ;;  %v2603_v13 = vadd.f32 %v2587_v0, %v1231_v16  ;;  %v3194_v32 = vpop.f32.mrb[8].mxu0  ;;  %v3350_v39 = vpop.f32.mrb[8].mxu1 }
 0x1a5   :  { %2686 = vst [vmem:[#allocation8 + $0x18] sm:$0xff] %v2670_v37  ;;  %v1332_v40 = vmin.f32 %v1316_v38, 1e+30  ;;  %v1279_v41 = vmax.f32 %v1263_v61, 0.0  ;;  %v1266_v45 = vadd.f32 %v1250_v28, %v1234_v27  ;;  %v2606_v50 = vadd.f32 %v2590_v30, %v1234_v27  ;;  %v1181_v48 = vpop.f32.mrb[9].mxu0  ;;  %v2521_v57 = vpop.f32.mrb[9].mxu1 }
 0x1a6   :  { %2685 = vst [vmem:[#allocation8 + $0x10] sm:$0xff] %v2669_v8  ;;  %v2619_v5 = vmax.f32 %v2603_v13, 0.0  ;;  %v1249_v6 = vadd.f32 %v1169_v24, %v4101_v4  ;;  %v2589_v59 = vadd.f32 %v2509_v3, %v4103_v9  ;;  %v1252_v54 = vadd.f32 %v3194_v32, %v4101_v4  ;;  %v1238_v32 = vld [vmem:[%s4325_s2 + $0x58] sm:$0xff] }
 0x1a7   :  { %v2672_v46 = vmin.f32 %v1332_v40, %v2656_v10  ;;  %v1315_v53 = vadd.f32 %v4118_v29, %v1279_v41  ;;  %v4204_v55 = vmin.f32 %v1275_v22, %v1279_v41  ;;  %v1282_v63 = vmax.f32 %v1266_v45, 0.0  ;;  %v1237_v41 = vld [vmem:[%s4325_s2 + $0x50] sm:$0xff] }
 0x1a8   :  { %v2655_v62 = vadd.f32 %v4122_v33, %v2619_v5  ;;  %v4212_v2 = vmin.f32 %v2615_v31, %v2619_v5  ;;  %v2622_v35 = vmax.f32 %v2606_v50, 0.0  ;;  %v1265_v21 = vadd.f32 %v1249_v6, %v1233_v56  ;;  %v3197_v43 = vpop.f32.mrb[10].mxu0  ;;  %v3353_v1 = vpop.f32.mrb[10].mxu1 }
 0x1a9   :  { %2688 = vst [vmem:[#allocation8 + $0x28] sm:$0xff] %v2672_v46  ;;  %v1331_v15 = vmin.f32 %v1315_v53, 1e+30  ;;  %v1318_v34 = vadd.f32 %v4118_v29, %v1282_v63  ;;  %v4217_v22 = vmin.f32 %v1278_v14, %v1282_v63  ;;  %v2605_v16 = vadd.f32 %v2589_v59, %v1233_v56  ;;  %v1193_v17 = vpop.f32.mrb[11].mxu0  ;;  %v2533_v18 = vpop.f32.mrb[11].mxu1 }
 0x1aa   :  { %v2658_v19 = vadd.f32 %v4122_v33, %v2622_v35  ;;  %v4222_v36 = vmin.f32 %v2618_v49, %v2622_v35  ;;  %v1281_v31 = vmax.f32 %v1265_v21, 0.0  ;;  %v1268_v20 = vadd.f32 %v1252_v54, %v1236_v7 }
 0x1ab   :  { %v2671_v23 = vmin.f32 %v1331_v15, %v2655_v62  ;;  %v1334_v0 = vmin.f32 %v1318_v34, 1e+30  ;;  %v2621_v24 = vmax.f32 %v2605_v16, 0.0  ;;  %v2592_v3 = vadd.f32 %v3350_v39, %v4103_v9 }
 0x1ac   :  { %v1317_v14 = vadd.f32 %v4118_v29, %v1281_v31  ;;  %v1361_v25 = vmin.f32 %v1277_v58, %v1281_v31  ;;  %v1284_v26 = vmax.f32 %v1268_v20, 0.0  ;;  %v1251_v44 = vadd.f32 %v1181_v48, %v4101_v4  ;;  %v3200_v49 = vpop.f32.mrb[12].mxu0  ;;  %v3356_v27 = vpop.f32.mrb[12].mxu1 }
 0x1ad   :  { %2687 = vst [vmem:[#allocation8 + $0x20] sm:$0xff] %v2671_v23  ;;  %v2674_v28 = vmin.f32 %v1334_v0, %v2658_v19  ;;  %v2657_v30 = vadd.f32 %v4122_v33, %v2621_v24  ;;  %v4235_v37 = vmin.f32 %v2617_v60, %v2621_v24  ;;  %v2608_v38 = vadd.f32 %v2592_v3, %v1236_v7  ;;  %v1205_v61 = vpop.f32.mrb[13].mxu0  ;;  %v2545_v8 = vpop.f32.mrb[13].mxu1 }
 0x1ae   :  { %v1333_v10 = vmin.f32 %v1317_v14, 1e+30  ;;  %v1320_v51 = vadd.f32 %v4118_v29, %v1284_v26  ;;  %v4239_v58 = vmin.f32 %v4190_v47, %v1284_v26  ;;  %v1267_v13 = vadd.f32 %v1251_v44, %v1235_v42 }
 0x1af   :  { %2690 = vst [vmem:[#allocation8 + $0x38] sm:$0xff] %v2674_v28  ;;  %v2624_v39 = vmax.f32 %v2608_v38, 0.0  ;;  %v2591_v52 = vadd.f32 %v2521_v57, %v4103_v9  ;;  %v1254_v60 = vadd.f32 %v3197_v43, %v4101_v4  ;;  %v2594_v40 = vadd.f32 %v3353_v1, %v4103_v9 }
 0x1b0   :  { %v2673_v45 = vmin.f32 %v1333_v10, %v2657_v30  ;;  %v1336_v47 = vmin.f32 %v1320_v51, 1e+30  ;;  %v1283_v50 = vmax.f32 %v1267_v13, 0.0  ;;  %v1253_v56 = vadd.f32 %v1193_v17, %v4101_v4  ;;  %v3203_v48 = vpop.f32.mrb[14].mxu0  ;;  %v3359_v5 = vpop.f32.mrb[14].mxu1  ;;  %v1240_v17 = vld [vmem:[%s4325_s2 + $0x68] sm:$0xff] }
 0x1b1   :  { %v2660_v6 = vadd.f32 %v4122_v33, %v2624_v39  ;;  %v2704_v59 = vmin.f32 %v4193_v11, %v2624_v39  ;;  %v2607_v57 = vadd.f32 %v2591_v52, %v1235_v42  ;;  %v1270_v54 = vadd.f32 %v1254_v60, %v1238_v32  ;;  %v1217_v46 = vpop.f32.mrb[15].mxu0  ;;  %v4253_v53 = vpop.f32.mrb[15].mxu1 }
 0x1b2   :  { %2689 = vst [vmem:[#allocation8 + $0x30] sm:$0xff] %v2673_v45  ;;  %v1319_v63 = vadd.f32 %v4118_v29, %v1283_v50  ;;  %v1363_v7 = vmin.f32 %v4204_v55, %v1283_v50  ;;  %v2610_v62 = vadd.f32 %v2594_v40, %v1238_v32  ;;  %v1269_v35 = vadd.f32 %v1253_v56, %v1237_v41 }
 0x1b3   :  { %v2676_v21 = vmin.f32 %v1336_v47, %v2660_v6  ;;  %v2623_v43 = vmax.f32 %v2607_v57, 0.0  ;;  %v1286_v1 = vmax.f32 %v1270_v54, 0.0  ;;  %v2593_v15 = vadd.f32 %v2533_v18, %v4103_v9 }
 0x1b4   :  { %v1335_v34 = vmin.f32 %v1319_v63, 1e+30  ;;  %v2626_v16 = vmax.f32 %v2610_v62, 0.0  ;;  %v1285_v11 = vmax.f32 %v1269_v35, 0.0  ;;  %v1256_v19 = vadd.f32 %v3200_v49, %v4101_v4  ;;  %v1239_v49 = vld [vmem:[%s4325_s2 + $0x60] sm:$0xff] }
 0x1b5   :  { %2692 = vst [vmem:[#allocation8 + $0x48] sm:$0xff] %v2676_v21  ;;  %v2659_v31 = vadd.f32 %v4122_v33, %v2623_v43  ;;  %v2703_v55 = vmin.f32 %v4212_v2, %v2623_v43  ;;  %v1322_v20 = vadd.f32 %v4118_v29, %v1286_v1  ;;  %v1366_v23 = vmin.f32 %v4217_v22, %v1286_v1 }
 0x1b6   :  { %v2662_v18 = vadd.f32 %v4122_v33, %v2626_v16  ;;  %v2706_v0 = vmin.f32 %v4222_v36, %v2626_v16  ;;  %v1321_v24 = vadd.f32 %v4118_v29, %v1285_v11  ;;  %v1365_v3 = vmin.f32 %v1361_v25, %v1285_v11  ;;  %v1242_v25 = vld [vmem:[%s4325_s2 + $0x78] sm:$0xff] }
 0x1b7   :  { %v2675_v42 = vmin.f32 %v1335_v34, %v2659_v31  ;;  %v1338_v14 = vmin.f32 %v1322_v20, 1e+30  ;;  %v2609_v26 = vadd.f32 %v2593_v15, %v1237_v41  ;;  %v1272_v44 = vadd.f32 %v1256_v19, %v1240_v17 }
 0x1b8   :  { %v1337_v2 = vmin.f32 %v1321_v24, 1e+30  ;;  %v2596_v28 = vadd.f32 %v3356_v27, %v4103_v9  ;;  %v1255_v22 = vadd.f32 %v1205_v61, %v4101_v4  ;;  %v2595_v30 = vadd.f32 %v2545_v8, %v4103_v9 }
 0x1b9   :  { %2691 = vst [vmem:[#allocation8 + $0x40] sm:$0xff] %v2675_v42  ;;  %v2678_v36 = vmin.f32 %v1338_v14, %v2662_v18  ;;  %v2625_v38 = vmax.f32 %v2609_v26, 0.0  ;;  %v1288_v10 = vmax.f32 %v1272_v44, 0.0  ;;  %v1258_v51 = vadd.f32 %v3203_v48, %v4101_v4 }
 0x1ba   :  { %v2612_v13 = vadd.f32 %v2596_v28, %v1240_v17  ;;  %v1271_v32 = vadd.f32 %v1255_v22, %v1239_v49  ;;  %v2611_v39 = vadd.f32 %v2595_v30, %v1239_v49  ;;  %v2598_v52 = vadd.f32 %v3359_v5, %v4103_v9  ;;  %v1241_v5 = vld [vmem:[%s4325_s2 + $0x70] sm:$0xff]  ;;  %s3605_s2 = smov [#allocation8]  }
 0x1bb   :  { %2694 = vst [vmem:[#allocation8 + $0x58] sm:$0xff] %v2678_v36  ;;  %v2661_v27 = vadd.f32 %v4122_v33, %v2625_v38  ;;  %v2705_v61 = vmin.f32 %v4235_v37, %v2625_v38  ;;  %v1324_v8 = vadd.f32 %v4118_v29, %v1288_v10  ;;  %v1368_v60 = vmin.f32 %v4239_v58, %v1288_v10  ;;  %s2818_s8 = sshll.u32 %s3605_s2, 4  ;;  %s2819_s8 = int_to_ptr.vmem [resolvable:$true] %s2818_s8 }
 0x1bc   :  { %v2628_v40 = vmax.f32 %v2612_v13, 0.0  ;;  %v1287_v41 = vmax.f32 %v1271_v32, 0.0  ;;  %v2627_v45 = vmax.f32 %v2611_v39, 0.0  ;;  %v1274_v47 = vadd.f32 %v1258_v51, %v1242_v25  ;;  %s3552_s9 = scalar_lea.vmem %s2819_s8, 2048  ;;  %p3557_p9 = scmp.lt.s32.totalorder %s2819_s8, %s2819_s8 }
 0x1bd   :  { %v2677_v50 = vmin.f32 %v1337_v2, %v2661_v27  ;;  %v1340_v56 = vmin.f32 %v1324_v8, 1e+30  ;;  %v2614_v48 = vadd.f32 %v2598_v52, %v1242_v25  ;;  %v1257_v6 = vadd.f32 %v1217_v46, %v4101_v4  ;;  %p3553_p8 = scmp.ne.s32.totalorder %s2819_s8, %s3552_s9  ;;  %p3558_p10 = scmp.lt.s32.totalorder %s3552_s9, %s3552_s9 }
 0x1be   :  { %v2664_v57 = vadd.f32 %v4122_v33, %v2628_v40  ;;  %v2708_v37 = vmin.f32 %v2704_v59, %v2628_v40  ;;  %v1323_v54 = vadd.f32 %v4118_v29, %v1287_v41  ;;  %v1367_v63 = vmin.f32 %v1363_v7, %v1287_v41 }
 0x1bf   :  { %2693 = vst [vmem:[#allocation8 + $0x50] sm:$0xff] %v2677_v50  ;;  %v2663_v58 = vadd.f32 %v4122_v33, %v2627_v45  ;;  %v2707_v62 = vmin.f32 %v2703_v55, %v2627_v45  ;;  %v1290_v35 = vmax.f32 %v1274_v47, 0.0  ;;  %v2630_v21 = vmax.f32 %v2614_v48, 0.0  ;;  %p3559_p11 = por %p3558_p10, %p3557_p9 }
 0x1c0   :  { %v2680_v43 = vmin.f32 %v1340_v56, %v2664_v57  ;;  %v1339_v1 = vmin.f32 %v1323_v54, 1e+30  ;;  %v1371_v15 = vmin.f32 %v1367_v63, %v1368_v60  ;;  %v1273_v34 = vadd.f32 %v1257_v6, %v1241_v5 }
 0x1c1   :  { %v2711_v16 = vmin.f32 %v2707_v62, %v2708_v37  ;;  %v1326_v11 = vadd.f32 %v4118_v29, %v1290_v35  ;;  %v1370_v4 = vmin.f32 %v1366_v23, %v1290_v35  ;;  %v2710_v59 = vmin.f32 %v2706_v0, %v2630_v21  ;;  %p3560_p12 = pnand %p3559_p11, %p3553_p8 }
 0x1c2   :  { %2696 = vst [vmem:[#allocation8 + $0x68] sm:$0xff] %v2680_v43  ;;  %v2679_v46 = vmin.f32 %v1339_v1, %v2663_v58  ;;  %v1289_v17 = vmax.f32 %v1273_v34, 0.0  ;;  %v2597_v7 = vadd.f32 %v4253_v53, %v4103_v9  ;;  %v2666_v31 = vadd.f32 %v4122_v33, %v2630_v21 }
 0x1c3   :  { %v1342_v19 = vmin.f32 %v1326_v11, 1e+30 }
 0x1c4   :  { %2695 = vst [vmem:[#allocation8 + $0x60] sm:$0xff] %v2679_v46  ;;  %v1325_v55 = vadd.f32 %v4118_v29, %v1289_v17  ;;  %v1369_v20 = vmin.f32 %v1365_v3, %v1289_v17  ;;  %v2613_v18 = vadd.f32 %v2597_v7, %v1241_v5 }
 0x1c5   :  { %v2682_v24 = vmin.f32 %v1342_v19, %v2666_v31 }
 0x1c6   :  { %v1341_v42 = vmin.f32 %v1325_v55, 1e+30  ;;  %v1372_v14 = vmin.f32 %v1369_v20, %v1370_v4  ;;  %v2629_v26 = vmax.f32 %v2613_v18, 0.0 }
 0x1c7   :  { %2698 = vst [vmem:[#allocation8 + $0x78] sm:$0xff] %v2682_v24 }
 0x1c8   :  { %v1373_v23 = vmin.f32 %v1371_v15, %v1372_v14  ;;  %v2665_v0 = vadd.f32 %v4122_v33, %v2629_v26  ;;  %v2709_v44 = vmin.f32 %v2705_v61, %v2629_v26 }
 0x1ca   :  { %v1374_v9 = vrot.slane %v1373_v23, 4  ;;  %v2681_v53 = vmin.f32 %v1341_v42, %v2665_v0  ;;  %v2712_v49 = vmin.f32 %v2709_v44, %v2710_v59 }
 0x1cc   :  { %v1375_v2 = vmin.f32 %v1373_v23, %v1374_v9  ;;  %2697 = vst [vmem:[#allocation8 + $0x70] sm:$0xff] %v2681_v53  ;;  %v2713_v29 = vmin.f32 %v2711_v16, %v2712_v49 }
 0x1cd   :  { %3563 = shalt.err (!%p3560_p12)
}
 0x1ce   :  { %s3564_s12 = scalar_lea.hbm %s4326_s3, 2048 }
 0x1cf   :  { %p3565_p13 = scmp.ne.s32.totalorder %s4326_s3, %s3564_s12  ;;  %p3568_p0 = scmp.lt.u32.totalorder %s3564_s12, %s4326_s3 }
 0x1d1   :  { %p3570_p1 = pnand %p3568_p0, %p3565_p13 }
 0x1d3   :  { %3573 = shalt.err (!%p3570_p1)
}
 0x1d4   :  { %s3606_s17 = smov 128   ;;  %s3607_s18 = smov 8   ;;  %v1376_v33 = vrot.slane %v1375_v2, 2  ;;  %v2714_v3 = vrot.slane %v2713_v29, 4  ;;  %v3528_v51 = vld [vmem:[#allocation5] sm:$0xff]  ;;  %v3529_v39 = vld [vmem:[#allocation5 + $0x8] sm:$0xff] }
 0x1d5   :  { %2824 = dma.vmem_to_hbm [thread:$0]  %s2819_s8, 2048, %s4326_s3, [#allocation7], %s3606_s17, %s3606_s17, %s3607_s18   ;;  %v2740_v40 = vld [vmem:[#allocation2] sm:$0x1] }
 0x1d6   :  { %v1377_v28 = vmin.f32 %v1375_v2, %v1376_v33  ;;  %v2715_v22 = vmin.f32 %v2713_v29, %v2714_v3  ;;  %s3608_s3 = smov [#allocation9]  }
 0x1d7   :  { %s2831_s21 = sshll.u32 %s3608_s3, 4  ;;  %s2832_s21 = int_to_ptr.vmem [resolvable:$true] %s2831_s21 }
 0x1d8   :  { %v1378_v30 = vrot.slane %v1377_v28, 1  ;;  %v2716_v36 = vrot.slane %v2715_v22, 2  ;;  %s3574_s22 = scalar_lea.vmem %s2832_s21, 128  ;;  %p3579_p3 = scmp.lt.s32.totalorder %s2832_s21, %s2832_s21 }
 0x1d9   :  { %p3575_p2 = scmp.ne.s32.totalorder %s2832_s21, %s3574_s22  ;;  %p3580_p4 = scmp.lt.s32.totalorder %s3574_s22, %s3574_s22 }
 0x1da   :  { %v1379_v38 = vmin.f32 %v1377_v28, %v1378_v30  ;;  %v2717_v10 = vmin.f32 %v2715_v22, %v2716_v36 }
 0x1db   :  { %p3581_p5 = por %p3580_p4, %p3579_p3 }
 0x1dc   :  { %v2718_v25 = vrot.slane %v2717_v10, 1  ;;  %v1380_v13 = vmul.f32 %v3528_v51, %v1379_v38 }
 0x1dd   :  { %p3582_p6 = pnand %p3581_p5, %p3575_p2 }
 0x1de   :  { %v2719_v32 = vmin.f32 %v2717_v10, %v2718_v25 }
 0x1e0   :  { %v2720_v52 = vmul.f32 %v3529_v39, %v2719_v32 }
 0x1e2   :  { %v2721_v27 = vadd.f32 %v2720_v52, %v1380_v13 }
 0x1e4   :  { %v2748_v61 = vrot.slane %v2721_v27, %v4087_v12 }
 0x1e6   :  { %v2749_v8 = vcombine.high %v2748_v61, %v2748_v61 }
 0x1e8   :  { %v2756_v60 = vrot.slane %v2749_v8, %v4087_v12 }
 0x1ea   :  { %v2757_v41 = vcombine.high %v2756_v60, %v2756_v60 }
 0x1ec   :  { %v2759_v45 = vadd.f32 %v2757_v41, %v2740_v40 }
 0x1ee   :  { %2760 = vst [vmem:[#allocation2] sm:$0x1] %v2759_v45 }
 0x1f5   :  { %v2806_v47 = vld [vmem:[#allocation2] sm:$0x1] }
 0x1f6   :  { %2807 = vst [vmem:[#allocation9] sm:$0x1] %v2806_v47 }
 0x1f7   :  { %3585 = shalt.err (!%p3582_p6)
}
 0x1f8   :  { %s3586_s25 = scalar_lea.hbm %s4327_s4, 128 }
 0x1f9   :  { %p3587_p7 = scmp.ne.s32.totalorder %s4327_s4, %s3586_s25  ;;  %p3590_p8 = scmp.lt.u32.totalorder %s3586_s25, %s4327_s4 }
 0x1fb   :  { %p3592_p9 = pnand %p3590_p8, %p3587_p7 }
 0x1fd   :  { %3595 = shalt.err (!%p3592_p9)
}
 0x1fe   :  { %2834 = dma.vmem_to_hbm [thread:$0]  %s2832_s21, 128, %s4327_s4, [#allocation10]  }
 0x1ff   :  { %3598 = dma.done.wait [#allocation7], 2048  }
 0x200   :  { %3599 = vsyncadd [#allocation7], 4294965248 }
 0x201   :  { %3600 = dma.done.wait [#allocation10], 128  }
 0x202   :  { %3601 = vsyncadd [#allocation10], 4294967168 }
 0x203   :  { %2841 = vsyncpa [#allocation6], 1 }
 0x204   :  { %2842 = vsyncpa [#allocation7], 1 }
 0x205   :  { %2843 = vsyncpa [#allocation10], 1 }

</bundles_post_ra>
